<compile_context>
chip_gen: v5e
topology: v5e:2x2
jax: 0.10.0
libtpu: 0.0.40
codegen_flags: <defaults>
</compile_context>

<pallas_src>
import functools

import jax
import jax.numpy as jnp
from jax.experimental import pallas as pl
from jax.experimental.pallas import tpu as pltpu


# ---------------------------------------------------------------------------
# Kernel (batch-on-lanes: every activation is (rows, TB), TB on the lane axis)
# ---------------------------------------------------------------------------
def _net_dgm_kernel(txT_ref, winT_ref, binC_ref, wxallT_ref, bgallC_ref,
                    ws_zgr_ref, ws_h_ref, woutC_ref, bout_ref, out_ref, *,
                    dim_S):
    """Net_DGM forward for one batch tile, entirely in VMEM.

    txT_ref    : (dim_in, TB)        batch on lanes
    winT_ref   : (dim_S, dim_in)     binC_ref   : (dim_S, 1)
    wxallT_ref : (12*dim_S, dim_in)  all (layer, gate) tx-side weights, transposed
    bgallC_ref : (12*dim_S, 1)       all (layer, gate) biases, as a column
    ws_zgr_ref : (3, 3*dim_S, dim_S) per-layer Z/G/R S-side weights, transposed
    ws_h_ref   : (3, dim_S, dim_S)   per-layer H  S-side weights, transposed
    woutC_ref  : (dim_S, 1)          bout_ref   : (1, 1)
    out_ref    : (1, 1, TB)          lane-dense output row
    """
    txT = txT_ref[...]                                          # (dim_in, TB)

    # input_layer: S^T = tanh(W_in^T @ tx^T + b_in)
    S = jnp.tanh(
        jnp.dot(winT_ref[...], txT, preferred_element_type=jnp.float32)
        + binC_ref[...])                                        # (dim_S, TB)

    # Hoisted: every gate's tx-side matmul + bias in one lane-dense matmul.
    TXW = (jnp.dot(wxallT_ref[...], txT, preferred_element_type=jnp.float32)
           + bgallC_ref[...])                                   # (12*dim_S, TB)

    # Three DGM layers, statically unrolled (all slice offsets static and
    # 8-sublane aligned -> no lane rotates / gathers).
    for layer in range(3):
        base = layer * 4 * dim_S
        txw_zgr = TXW[base:base + 3 * dim_S, :]                 # (3*dim_S, TB)
        txw_h = TXW[base + 3 * dim_S:base + 4 * dim_S, :]       # (dim_S, TB)

        # Z, G, R all consume the same S -> one fused (3*dim_S,dim_S)@(dim_S,TB).
        ZGR = jnp.tanh(
            txw_zgr
            + jnp.dot(ws_zgr_ref[layer], S,
                      preferred_element_type=jnp.float32))      # (3*dim_S, TB)
        Z = ZGR[0 * dim_S:1 * dim_S, :]
        G = ZGR[1 * dim_S:2 * dim_S, :]
        R = ZGR[2 * dim_S:3 * dim_S, :]

        Hh = jnp.tanh(
            txw_h
            + jnp.dot(ws_h_ref[layer], S * R,
                      preferred_element_type=jnp.float32))      # (dim_S, TB)

        S = (1.0 - G) * Hh + Z * S

    # output_layer: Linear(dim_S -> 1) == w_out^T @ S^T.  VPU multiply +
    # sublane (XLU) reduction; result is a fully lane-dense (1, TB) row.
    out_ref[0] = (jnp.sum(woutC_ref[...] * S, axis=0, keepdims=True)
                  + bout_ref[...])


# ---------------------------------------------------------------------------
# One-time weight packing (layout plumbing only — do NOT call per forward)
# ---------------------------------------------------------------------------
def pack_params(params):
    """Pack Net_DGM parameters into the transposed, fused kernel layout."""
    dim_in, dim_S = params["w_in"].shape
    # tx-side gate weights: (3,4,dim_in,dim_S) -> (12*dim_S, dim_in),
    # row order = layer-major, gate-major, unit-minor (matches TXW slicing).
    wxall_t = jnp.transpose(params["wx"], (0, 1, 3, 2)).reshape(12 * dim_S, dim_in)
    bgall_c = params["bg"].reshape(12 * dim_S, 1)
    # S-side gate weights, transposed: (3,4,dim_S_in,dim_S_out) -> (3,4,out,in)
    ws_t = jnp.transpose(params["ws"], (0, 1, 3, 2))
    return {
        "win_t": params["w_in"].T,                      # (dim_S, dim_in)
        "bin_c": params["b_in"].reshape(dim_S, 1),      # (dim_S, 1)
        "wxall_t": wxall_t,                             # (12*dim_S, dim_in)
        "bgall_c": bgall_c,                             # (12*dim_S, 1)
        "ws_zgr_t": ws_t[:, :3].reshape(3, 3 * dim_S, dim_S),
        "ws_h_t": ws_t[:, 3],                           # (3, dim_S, dim_S)
        "wout_c": params["w_out"].reshape(dim_S, 1),    # (dim_S, 1)
        "bout": params["b_out"].reshape(1, 1),          # (1, 1)
    }


# ---------------------------------------------------------------------------
# Chip-aware batch tiling
# ---------------------------------------------------------------------------
def _num_tensorcores_per_chip():
    """Best effort: v7x has 2 TensorCores/chip, earlier TPUs have 1."""
    try:
        kind = jax.devices()[0].device_kind.lower()
        return 2 if "v7" in kind else 1
    except Exception:
        return 1


def _vmem_capacity_bytes():
    try:
        return int(pltpu.get_tpu_info().vmem_capacity_bytes)
    except Exception:
        return 64 * 1024 * 1024   # conservative (v7x per-TC VMEM)


def _choose_batch_tiling(B, dim_S):
    """Pick (tb, pad_B). Lane tiles must be multiples of 128.

    Single-TC chips (v5e/v6e): as few tiles as the VMEM budget allows
    (ideally one) to kill per-grid-step overhead.  v7x: keep >= 2 tiles so
    dimension_semantics=('parallel',) shards across both TensorCores.
    """
    padded = pl.cdiv(max(B, 1), 128) * 128
    # Per-tile live activations ~ (12 + ~6)*dim_S f32 per batch column
    # (TXW dominates); keep them well under the per-generation VMEM budget.
    budget = _vmem_capacity_bytes() // 4
    cap = max(128, (budget // (20 * dim_S * 4)) // 128 * 128)
    cap = min(cap, 4096)
    if _num_tensorcores_per_chip() >= 2 and padded >= 256:
        tb = min(cap, max(128, (padded // 2) // 128 * 128))
    else:
        tb = min(cap, padded)
    pad_B = pl.cdiv(padded, tb) * tb
    return tb, pad_B


# ---------------------------------------------------------------------------
# Forward wrapper
# ---------------------------------------------------------------------------
def net_dgm_forward(t, x, packed, *, tile_b=None):
    """Run the Net_DGM forward.  `packed` comes from pack_params (called once)."""
    dim_S = packed["win_t"].shape[0]
    # Batch-on-lanes input: (dim_in, B).  Tiny (B, 3) transpose; layout only.
    txT = jnp.concatenate([t, x], axis=1).astype(jnp.float32).T
    dim_in, B = txT.shape

    if tile_b is None:
        tb, pad_B = _choose_batch_tiling(B, dim_S)
    else:
        tb = max(128, (tile_b // 128) * 128)
        pad_B = pl.cdiv(max(B, 128), tb) * tb
    if pad_B != B:
        txT = jnp.pad(txT, ((0, 0), (0, pad_B - B)))
    num_tiles = pad_B // tb

    def _resident(arr):
        # Full array in VMEM; same block every grid step -> stays resident.
        nd = arr.ndim
        return pl.BlockSpec(arr.shape, lambda i, nd=nd: (0,) * nd)

    weights = (packed["win_t"], packed["bin_c"], packed["wxall_t"],
               packed["bgall_c"], packed["ws_zgr_t"], packed["ws_h_t"],
               packed["wout_c"], packed["bout"])

    out = pl.pallas_call(
        functools.partial(_net_dgm_kernel, dim_S=dim_S),
        out_shape=jax.ShapeDtypeStruct((num_tiles, 1, tb), jnp.float32),
        grid=(num_tiles,),
        in_specs=[pl.BlockSpec((dim_in, tb), lambda i: (0, i))]
                 + [_resident(w) for w in weights],
        out_specs=pl.BlockSpec((1, 1, tb), lambda i: (i, 0, 0)),
        compiler_params=pltpu.CompilerParams(
            dimension_semantics=("parallel",)),   # megacore sharding on v7x
    )(txT, *weights)

    # (num_tiles, 1, tb) row-major == batch order; drop padded rows.
    return out.reshape(pad_B, 1)[:B]


# ---------------------------------------------------------------------------
# Parameters + pure-JAX reference (for the correctness check)
# ---------------------------------------------------------------------------
def init_params(key, dim_x, dim_S):
    """Deterministic synthetic parameters matching Net_DGM(dim_x, dim_S) shapes."""
    dim_in = dim_x + 1
    dim_cat = dim_in + dim_S
    ks = jax.random.split(key, 8)
    scale_in = 1.0 / jnp.sqrt(dim_in)
    scale_cat = 1.0 / jnp.sqrt(dim_cat)
    scale_out = 1.0 / jnp.sqrt(dim_S)

    # DGM gate Linear(dim_cat -> dim_S) weights, split into tx part and S part.
    w_gate = jax.random.uniform(ks[2], (3, 4, dim_cat, dim_S), jnp.float32,
                                -scale_cat, scale_cat)
    params = {
        "w_in": jax.random.uniform(ks[0], (dim_in, dim_S), jnp.float32,
                                   -scale_in, scale_in),
        "b_in": jax.random.uniform(ks[1], (1, dim_S), jnp.float32,
                                   -scale_in, scale_in),
        "wx": w_gate[:, :, :dim_in, :],     # (3, 4, dim_in, dim_S)
        "ws": w_gate[:, :, dim_in:, :],     # (3, 4, dim_S,  dim_S)
        "bg": jax.random.uniform(ks[3], (3, 4, 1, dim_S), jnp.float32,
                                 -scale_cat, scale_cat),
        "w_out": jax.random.uniform(ks[4], (dim_S, 1), jnp.float32,
                                    -scale_out, scale_out),
        "b_out": jax.random.uniform(ks[5], (1, 1), jnp.float32,
                                    -scale_out, scale_out),
    }
    return params


def net_dgm_reference(t, x, params):
    """Pure-JAX reference of the same forward (batch-major layout)."""
    tx = jnp.concatenate([t, x], axis=1).astype(jnp.float32)
    S = jnp.tanh(tx @ params["w_in"] + params["b_in"])
    for layer in range(3):
        def gate(g, s_in):
            return jnp.tanh(tx @ params["wx"][layer, g]
                            + s_in @ params["ws"][layer, g]
                            + params["bg"][layer, g])
        Z = gate(0, S)
        G = gate(1, S)
        R = gate(2, S)
        Hh = gate(3, S * R)
        S = (1.0 - G) * Hh + Z * S
    return S @ params["w_out"] + params["b_out"]


if __name__ == "__main__":
    dim_x = 2       # matches the 2x2 H/R matrices in the original script
    dim_S = 32
    batch = 256

    key = jax.random.PRNGKey(0)
    k_params, k_t, k_x = jax.random.split(key, 3)

    params = init_params(k_params, dim_x, dim_S)
    packed = pack_params(params)          # one-time weight packing
    t = jax.random.normal(k_t, (batch, 1), jnp.float32)
    x = jax.random.normal(k_x, (batch, dim_x), jnp.float32)

    out = net_dgm_forward(t, x, packed)
    out = jax.block_until_ready(out)

    ref = net_dgm_reference(t, x, params)
    assert out.shape == (batch, 1)
    assert jnp.allclose(out, ref, atol=2e-5, rtol=1e-4), (
        float(jnp.max(jnp.abs(out - ref))))

    print("KERNEL_OK")
</pallas_src>

<mosaic_0001>
module attributes {stable_mosaic.version = 11 : i64} {
  func.func @_net_dgm_kernel(%arg0: i32, %arg1: memref<3x256xf32, #tpu.memory_space<vmem>>, %arg2: memref<32x3xf32, #tpu.memory_space<vmem>>, %arg3: memref<32x1xf32, #tpu.memory_space<vmem>>, %arg4: memref<384x3xf32, #tpu.memory_space<vmem>>, %arg5: memref<384x1xf32, #tpu.memory_space<vmem>>, %arg6: memref<3x96x32xf32, #tpu.memory_space<vmem>>, %arg7: memref<3x32x32xf32, #tpu.memory_space<vmem>>, %arg8: memref<32x1xf32, #tpu.memory_space<vmem>>, %arg9: memref<1x1xf32, #tpu.memory_space<vmem>>, %arg10: memref<1x1x256xf32, #tpu.memory_space<vmem>>) attributes {dimension_semantics = [#tpu.dimension_semantics<parallel>], iteration_bounds = array<i64: 1>, scalar_prefetch = 0 : i64, scratch_operands = 0 : i64, tpu.core_type = #tpu.core_type<tc>, window_params = [{transform_indices = @transform_0, window_bounds = array<i64: 3, 256>}, {pipeline_mode = #tpu.pipeline_mode<synchronous>, transform_indices = @transform_1, window_bounds = array<i64: 32, 3>}, {pipeline_mode = #tpu.pipeline_mode<synchronous>, transform_indices = @transform_2, window_bounds = array<i64: 32, 1>}, {pipeline_mode = #tpu.pipeline_mode<synchronous>, transform_indices = @transform_3, window_bounds = array<i64: 384, 3>}, {pipeline_mode = #tpu.pipeline_mode<synchronous>, transform_indices = @transform_4, window_bounds = array<i64: 384, 1>}, {pipeline_mode = #tpu.pipeline_mode<synchronous>, transform_indices = @transform_5, window_bounds = array<i64: 3, 96, 32>}, {pipeline_mode = #tpu.pipeline_mode<synchronous>, transform_indices = @transform_6, window_bounds = array<i64: 3, 32, 32>}, {pipeline_mode = #tpu.pipeline_mode<synchronous>, transform_indices = @transform_7, window_bounds = array<i64: 32, 1>}, {pipeline_mode = #tpu.pipeline_mode<synchronous>, transform_indices = @transform_8, window_bounds = array<i64: 1, 1>}, {transform_indices = @transform_9, window_bounds = array<i64: 1, 1, 256>}]} {
    %c0 = arith.constant 0 : index
    %c0_0 = arith.constant 0 : index
    %0 = vector.load %arg1[%c0, %c0_0] : memref<3x256xf32, #tpu.memory_space<vmem>>, vector<3x256xf32>
    %c0_1 = arith.constant 0 : index
    %c0_2 = arith.constant 0 : index
    %1 = vector.load %arg2[%c0_1, %c0_2] : memref<32x3xf32, #tpu.memory_space<vmem>>, vector<32x3xf32>
    %cst = arith.constant dense<0.000000e+00> : vector<32x256xf32>
    %2 = tpu.matmul %1, %0, %cst {dimension_numbers = #tpu.dot_dimension_numbers<[1], [0], [0], [1], [0, 0, 1, 1], [], []>} : vector<32x3xf32>, vector<3x256xf32>, vector<32x256xf32> -> vector<32x256xf32>
    %c0_3 = arith.constant 0 : index
    %c0_4 = arith.constant 0 : index
    %3 = vector.load %arg3[%c0_3, %c0_4] : memref<32x1xf32, #tpu.memory_space<vmem>>, vector<32x1xf32>
    %4 = vector.broadcast %3 : vector<32x1xf32> to vector<32x256xf32>
    %5 = arith.addf %2, %4 : vector<32x256xf32>
    %6 = math.tanh %5 : vector<32x256xf32>
    %c0_5 = arith.constant 0 : index
    %c0_6 = arith.constant 0 : index
    %7 = vector.load %arg4[%c0_5, %c0_6] : memref<384x3xf32, #tpu.memory_space<vmem>>, vector<384x3xf32>
    %cst_7 = arith.constant dense<0.000000e+00> : vector<384x256xf32>
    %8 = tpu.matmul %7, %0, %cst_7 {dimension_numbers = #tpu.dot_dimension_numbers<[1], [0], [0], [1], [0, 0, 1, 1], [], []>} : vector<384x3xf32>, vector<3x256xf32>, vector<384x256xf32> -> vector<384x256xf32>
    %c0_8 = arith.constant 0 : index
    %c0_9 = arith.constant 0 : index
    %9 = vector.load %arg5[%c0_8, %c0_9] : memref<384x1xf32, #tpu.memory_space<vmem>>, vector<384x1xf32>
    %10 = vector.broadcast %9 : vector<384x1xf32> to vector<384x256xf32>
    %11 = arith.addf %8, %10 : vector<384x256xf32>
    %12 = vector.extract_strided_slice %11 {offsets = [0, 0], sizes = [96, 256], strides = [1, 1]} : vector<384x256xf32> to vector<96x256xf32>
    %13 = vector.extract_strided_slice %11 {offsets = [96, 0], sizes = [32, 256], strides = [1, 1]} : vector<384x256xf32> to vector<32x256xf32>
    %c0_10 = arith.constant 0 : index
    %c0_11 = arith.constant 0 : index
    %c0_12 = arith.constant 0 : index
    %14 = vector.load %arg6[%c0_10, %c0_11, %c0_12] : memref<3x96x32xf32, #tpu.memory_space<vmem>>, vector<1x96x32xf32>
    %15 = vector.shape_cast %14 : vector<1x96x32xf32> to vector<96x32xf32>
    %cst_13 = arith.constant dense<0.000000e+00> : vector<96x256xf32>
    %16 = tpu.matmul %15, %6, %cst_13 {dimension_numbers = #tpu.dot_dimension_numbers<[1], [0], [0], [1], [0, 0, 1, 1], [], []>} : vector<96x32xf32>, vector<32x256xf32>, vector<96x256xf32> -> vector<96x256xf32>
    %17 = arith.addf %12, %16 : vector<96x256xf32>
    %18 = math.tanh %17 : vector<96x256xf32>
    %19 = vector.extract_strided_slice %18 {offsets = [0, 0], sizes = [32, 256], strides = [1, 1]} : vector<96x256xf32> to vector<32x256xf32>
    %20 = vector.extract_strided_slice %18 {offsets = [32, 0], sizes = [32, 256], strides = [1, 1]} : vector<96x256xf32> to vector<32x256xf32>
    %21 = vector.extract_strided_slice %18 {offsets = [64, 0], sizes = [32, 256], strides = [1, 1]} : vector<96x256xf32> to vector<32x256xf32>
    %c0_14 = arith.constant 0 : index
    %c0_15 = arith.constant 0 : index
    %c0_16 = arith.constant 0 : index
    %22 = vector.load %arg7[%c0_14, %c0_15, %c0_16] : memref<3x32x32xf32, #tpu.memory_space<vmem>>, vector<1x32x32xf32>
    %23 = vector.shape_cast %22 : vector<1x32x32xf32> to vector<32x32xf32>
    %24 = arith.mulf %6, %21 : vector<32x256xf32>
    %cst_17 = arith.constant dense<0.000000e+00> : vector<32x256xf32>
    %25 = tpu.matmul %23, %24, %cst_17 {dimension_numbers = #tpu.dot_dimension_numbers<[1], [0], [0], [1], [0, 0, 1, 1], [], []>} : vector<32x32xf32>, vector<32x256xf32>, vector<32x256xf32> -> vector<32x256xf32>
    %26 = arith.addf %13, %25 : vector<32x256xf32>
    %27 = math.tanh %26 : vector<32x256xf32>
    %cst_18 = arith.constant 1.000000e+00 : f32
    %28 = vector.broadcast %cst_18 : f32 to vector<32x256xf32>
    %29 = arith.subf %28, %20 : vector<32x256xf32>
    %30 = arith.mulf %29, %27 : vector<32x256xf32>
    %31 = arith.mulf %19, %6 : vector<32x256xf32>
    %32 = arith.addf %30, %31 : vector<32x256xf32>
    %33 = vector.extract_strided_slice %11 {offsets = [128, 0], sizes = [96, 256], strides = [1, 1]} : vector<384x256xf32> to vector<96x256xf32>
    %34 = vector.extract_strided_slice %11 {offsets = [224, 0], sizes = [32, 256], strides = [1, 1]} : vector<384x256xf32> to vector<32x256xf32>
    %c1 = arith.constant 1 : index
    %c0_19 = arith.constant 0 : index
    %c0_20 = arith.constant 0 : index
    %35 = vector.load %arg6[%c1, %c0_19, %c0_20] : memref<3x96x32xf32, #tpu.memory_space<vmem>>, vector<1x96x32xf32>
    %36 = vector.shape_cast %35 : vector<1x96x32xf32> to vector<96x32xf32>
    %cst_21 = arith.constant dense<0.000000e+00> : vector<96x256xf32>
    %37 = tpu.matmul %36, %32, %cst_21 {dimension_numbers = #tpu.dot_dimension_numbers<[1], [0], [0], [1], [0, 0, 1, 1], [], []>} : vector<96x32xf32>, vector<32x256xf32>, vector<96x256xf32> -> vector<96x256xf32>
    %38 = arith.addf %33, %37 : vector<96x256xf32>
    %39 = math.tanh %38 : vector<96x256xf32>
    %40 = vector.extract_strided_slice %39 {offsets = [0, 0], sizes = [32, 256], strides = [1, 1]} : vector<96x256xf32> to vector<32x256xf32>
    %41 = vector.extract_strided_slice %39 {offsets = [32, 0], sizes = [32, 256], strides = [1, 1]} : vector<96x256xf32> to vector<32x256xf32>
    %42 = vector.extract_strided_slice %39 {offsets = [64, 0], sizes = [32, 256], strides = [1, 1]} : vector<96x256xf32> to vector<32x256xf32>
    %c1_22 = arith.constant 1 : index
    %c0_23 = arith.constant 0 : index
    %c0_24 = arith.constant 0 : index
    %43 = vector.load %arg7[%c1_22, %c0_23, %c0_24] : memref<3x32x32xf32, #tpu.memory_space<vmem>>, vector<1x32x32xf32>
    %44 = vector.shape_cast %43 : vector<1x32x32xf32> to vector<32x32xf32>
    %45 = arith.mulf %32, %42 : vector<32x256xf32>
    %cst_25 = arith.constant dense<0.000000e+00> : vector<32x256xf32>
    %46 = tpu.matmul %44, %45, %cst_25 {dimension_numbers = #tpu.dot_dimension_numbers<[1], [0], [0], [1], [0, 0, 1, 1], [], []>} : vector<32x32xf32>, vector<32x256xf32>, vector<32x256xf32> -> vector<32x256xf32>
    %47 = arith.addf %34, %46 : vector<32x256xf32>
    %48 = math.tanh %47 : vector<32x256xf32>
    %cst_26 = arith.constant 1.000000e+00 : f32
    %49 = vector.broadcast %cst_26 : f32 to vector<32x256xf32>
    %50 = arith.subf %49, %41 : vector<32x256xf32>
    %51 = arith.mulf %50, %48 : vector<32x256xf32>
    %52 = arith.mulf %40, %32 : vector<32x256xf32>
    %53 = arith.addf %51, %52 : vector<32x256xf32>
    %54 = vector.extract_strided_slice %11 {offsets = [256, 0], sizes = [96, 256], strides = [1, 1]} : vector<384x256xf32> to vector<96x256xf32>
    %55 = vector.extract_strided_slice %11 {offsets = [352, 0], sizes = [32, 256], strides = [1, 1]} : vector<384x256xf32> to vector<32x256xf32>
    %c2 = arith.constant 2 : index
    %c0_27 = arith.constant 0 : index
    %c0_28 = arith.constant 0 : index
    %56 = vector.load %arg6[%c2, %c0_27, %c0_28] : memref<3x96x32xf32, #tpu.memory_space<vmem>>, vector<1x96x32xf32>
    %57 = vector.shape_cast %56 : vector<1x96x32xf32> to vector<96x32xf32>
    %cst_29 = arith.constant dense<0.000000e+00> : vector<96x256xf32>
    %58 = tpu.matmul %57, %53, %cst_29 {dimension_numbers = #tpu.dot_dimension_numbers<[1], [0], [0], [1], [0, 0, 1, 1], [], []>} : vector<96x32xf32>, vector<32x256xf32>, vector<96x256xf32> -> vector<96x256xf32>
    %59 = arith.addf %54, %58 : vector<96x256xf32>
    %60 = math.tanh %59 : vector<96x256xf32>
    %61 = vector.extract_strided_slice %60 {offsets = [0, 0], sizes = [32, 256], strides = [1, 1]} : vector<96x256xf32> to vector<32x256xf32>
    %62 = vector.extract_strided_slice %60 {offsets = [32, 0], sizes = [32, 256], strides = [1, 1]} : vector<96x256xf32> to vector<32x256xf32>
    %63 = vector.extract_strided_slice %60 {offsets = [64, 0], sizes = [32, 256], strides = [1, 1]} : vector<96x256xf32> to vector<32x256xf32>
    %c2_30 = arith.constant 2 : index
    %c0_31 = arith.constant 0 : index
    %c0_32 = arith.constant 0 : index
    %64 = vector.load %arg7[%c2_30, %c0_31, %c0_32] : memref<3x32x32xf32, #tpu.memory_space<vmem>>, vector<1x32x32xf32>
    %65 = vector.shape_cast %64 : vector<1x32x32xf32> to vector<32x32xf32>
    %66 = arith.mulf %53, %63 : vector<32x256xf32>
    %cst_33 = arith.constant dense<0.000000e+00> : vector<32x256xf32>
    %67 = tpu.matmul %65, %66, %cst_33 {dimension_numbers = #tpu.dot_dimension_numbers<[1], [0], [0], [1], [0, 0, 1, 1], [], []>} : vector<32x32xf32>, vector<32x256xf32>, vector<32x256xf32> -> vector<32x256xf32>
    %68 = arith.addf %55, %67 : vector<32x256xf32>
    %69 = math.tanh %68 : vector<32x256xf32>
    %cst_34 = arith.constant 1.000000e+00 : f32
    %70 = vector.broadcast %cst_34 : f32 to vector<32x256xf32>
    %71 = arith.subf %70, %62 : vector<32x256xf32>
    %72 = arith.mulf %71, %69 : vector<32x256xf32>
    %73 = arith.mulf %61, %53 : vector<32x256xf32>
    %74 = arith.addf %72, %73 : vector<32x256xf32>
    %c0_35 = arith.constant 0 : index
    %c0_36 = arith.constant 0 : index
    %75 = vector.load %arg8[%c0_35, %c0_36] : memref<32x1xf32, #tpu.memory_space<vmem>>, vector<32x1xf32>
    %76 = vector.broadcast %75 : vector<32x1xf32> to vector<32x256xf32>
    %77 = arith.mulf %76, %74 : vector<32x256xf32>
    %cst_37 = arith.constant dense<0.000000e+00> : vector<256xf32>
    %78 = vector.multi_reduction <add>, %77, %cst_37 [0] : vector<32x256xf32> to vector<256xf32>
    %79 = vector.shape_cast %78 : vector<256xf32> to vector<1x256xf32>
    %c0_38 = arith.constant 0 : index
    %c0_39 = arith.constant 0 : index
    %80 = vector.load %arg9[%c0_38, %c0_39] : memref<1x1xf32, #tpu.memory_space<vmem>>, vector<1x1xf32>
    %81 = vector.broadcast %80 : vector<1x1xf32> to vector<1x256xf32>
    %82 = arith.addf %79, %81 : vector<1x256xf32>
    %c0_40 = arith.constant 0 : index
    %c0_41 = arith.constant 0 : index
    %c0_42 = arith.constant 0 : index
    %83 = vector.load %arg10[%c0_40, %c0_41, %c0_42] : memref<1x1x256xf32, #tpu.memory_space<vmem>>, vector<1x1x256xf32>
    %84 = vector.shape_cast %83 : vector<1x1x256xf32> to vector<1x256xf32>
    %85 = vector.shape_cast %82 : vector<1x256xf32> to vector<1x1x256xf32>
    tpu.vector_store %arg10[%c0_40, %c0_41, %c0_42], %85 {strides = array<i32>} : memref<1x1x256xf32, #tpu.memory_space<vmem>>, vector<1x1x256xf32>,
    return
  }
  func.func @transform_0(%arg0: i32) -> (i32, i32) {
    %c0_i32 = arith.constant 0 : i32
    %c0_i32_0 = arith.constant 0 : i32
    return %c0_i32, %arg0 : i32, i32
  }
  func.func @transform_1(%arg0: i32) -> (i32, i32) {
    %c0_i32 = arith.constant 0 : i32
    %c0_i32_0 = arith.constant 0 : i32
    %c0_i32_1 = arith.constant 0 : i32
    return %c0_i32, %c0_i32_0 : i32, i32
  }
  func.func @transform_2(%arg0: i32) -> (i32, i32) {
    %c0_i32 = arith.constant 0 : i32
    %c0_i32_0 = arith.constant 0 : i32
    %c0_i32_1 = arith.constant 0 : i32
    return %c0_i32, %c0_i32_0 : i32, i32
  }
  func.func @transform_3(%arg0: i32) -> (i32, i32) {
    %c0_i32 = arith.constant 0 : i32
    %c0_i32_0 = arith.constant 0 : i32
    %c0_i32_1 = arith.constant 0 : i32
    return %c0_i32, %c0_i32_0 : i32, i32
  }
  func.func @transform_4(%arg0: i32) -> (i32, i32) {
    %c0_i32 = arith.constant 0 : i32
    %c0_i32_0 = arith.constant 0 : i32
    %c0_i32_1 = arith.constant 0 : i32
    return %c0_i32, %c0_i32_0 : i32, i32
  }
  func.func @transform_5(%arg0: i32) -> (i32, i32, i32) {
    %c0_i32 = arith.constant 0 : i32
    %c0_i32_0 = arith.constant 0 : i32
    %c0_i32_1 = arith.constant 0 : i32
    %c0_i32_2 = arith.constant 0 : i32
    return %c0_i32, %c0_i32_0, %c0_i32_1 : i32, i32, i32
  }
  func.func @transform_6(%arg0: i32) -> (i32, i32, i32) {
    %c0_i32 = arith.constant 0 : i32
    %c0_i32_0 = arith.constant 0 : i32
    %c0_i32_1 = arith.constant 0 : i32
    %c0_i32_2 = arith.constant 0 : i32
    return %c0_i32, %c0_i32_0, %c0_i32_1 : i32, i32, i32
  }
  func.func @transform_7(%arg0: i32) -> (i32, i32) {
    %c0_i32 = arith.constant 0 : i32
    %c0_i32_0 = arith.constant 0 : i32
    %c0_i32_1 = arith.constant 0 : i32
    return %c0_i32, %c0_i32_0 : i32, i32
  }
  func.func @transform_8(%arg0: i32) -> (i32, i32) {
    %c0_i32 = arith.constant 0 : i32
    %c0_i32_0 = arith.constant 0 : i32
    %c0_i32_1 = arith.constant 0 : i32
    return %c0_i32, %c0_i32_0 : i32, i32
  }
  func.func @transform_9(%arg0: i32) -> (i32, i32, i32) {
    %c0_i32 = arith.constant 0 : i32
    %c0_i32_0 = arith.constant 0 : i32
    %c0_i32_1 = arith.constant 0 : i32
    return %arg0, %c0_i32, %c0_i32_0 : i32, i32, i32
  }
}

</mosaic_0001>

<bundles_post_ra>
// kernel: tpu_custom_call.1
= control target key start
LH: loop header
LB: loop body
LE: loop exit
PB: predicated region body
PF: predicated region fallthrough
CT: control target
= control target key end

     0   :  { %s3724_s0 = inlined_call_operand.vmem [shape: f32[3,256], index: 0, kind: input, shape index: {}]   ;;  %s3725_s1 = inlined_call_operand.vmem [shape: f32[32,3], index: 1, kind: input, shape index: {}]   ;;  %s3726_s2 = inlined_call_operand.vmem [shape: f32[32,1], index: 2, kind: input, shape index: {}]   ;;  %s3727_s3 = inlined_call_operand.vmem [shape: f32[384,3], index: 3, kind: input, shape index: {}]   ;;  %s3728_s4 = inlined_call_operand.vmem [shape: f32[384,1], index: 4, kind: input, shape index: {}]   ;;  %s3729_s5 = inlined_call_operand.vmem [shape: f32[3,96,32], index: 5, kind: input, shape index: {}]   ;;  %s3730_s6 = inlined_call_operand.vmem [shape: f32[3,32,32], index: 6, kind: input, shape index: {}]   ;;  %s3731_s7 = inlined_call_operand.vmem [shape: f32[32,1], index: 7, kind: input, shape index: {}]   ;;  %s3732_s8 = inlined_call_operand.<no memory space> [shape: f32[1,1], index: 8, kind: input, shape index: {}]   ;;  %s3733_s9 = inlined_call_operand.hbm [shape: f32[1,1,256], index: 9, kind: output, shape index: {}]  }
   0x1   :  { %v14_v0 = vstv %s3732_s8 }
   0x2   :  { %15 = vst [vmem:[#allocation2] sm:$0x1] %v14_v0 }
   0x3   :  { %v43_v1 = vld [vmem:[%s3726_s2 + $0x18] sm:$0xff]  ;;  %v41_v2 = vld [vmem:[%s3726_s2 + $0x8] sm:$0xff]  ;;  %v35_v3 = vld [vmem:[%s3724_s0] sm:$0x77]  ;;  %v2525_v4 = vmov 0   ;;  %vm81_vm0 = vcmask 1042432  }
   0x4   :  { %2289 = vset.pattern.permute.xlu1 %v2525_v4  ;;  %2288 = vset.pattern.permute.xlu0 %v2525_v4  ;;  %65 = vst [vmem:[#allocation1] ss:$2 sm:$0xff] %v35_v3 }
   0x5   :  { %61 = vperm.xlu0 %2288, %v43_v1   ;;  %51 = vperm.xlu1 %2289, %v41_v2  }
   0x6   :  { %2290 = vset.pattern.permute.xlu2 %v2525_v4 }
   0x7   :  { %16 = vsyncpa [#allocation4], 0  ;;  %v42_v5 = vld [vmem:[%s3726_s2 + $0x10] sm:$0xff]  ;;  %v40_v6 = vld [vmem:[%s3726_s2] sm:$0xff]  ;;  %vm68_vm1 = vcmask 23552   ;;  %vm973_vm2 = vcmask 261120  }
   0x8   :  { %v38_v7 = vld [vmem:[%s3725_s1 + $0x10] sm:$0xff]  ;;  %v36_v10 = vld [vmem:[%s3725_s1] sm:$0xff]  ;;  %v209_v11 = vld [vmem:[%s3728_s4 + $0x48] sm:$0xff]  ;;  %vm2024_vm3 = vcmask 1040384  }
   0x9   :  { %v208_v12 = vld [vmem:[%s3728_s4 + $0x40] sm:$0xff]  ;;  %v39_v13 = vld [vmem:[%s3725_s1 + $0x18] sm:$0xff]  ;;  %v37_v16 = vld [vmem:[%s3725_s1 + $0x8] sm:$0xff]  ;;  %s2039_s1 = sshll.u32 %s3733_s9, 4  ;;  %s2040_s1 = int_to_ptr.hbm [resolvable:$true] %s2039_s1 }
   0xa   :  { %v203_v17 = vld [vmem:[%s3728_s4 + $0x18] sm:$0xff]  ;;  %v206_v18 = vld [vmem:[%s3728_s4 + $0x30] sm:$0xff]  ;;  %v152_v19 = vld [vmem:[%s3727_s3] sm:$0xff] }
   0xb   :  { %v66_v8 = vld.sshfl [vmem:[#allocation1] sm:$0xff pattern:$0x75316420]  ;;  %v67_v9 = vld.sshfl [vmem:[#allocation1 + $0x8] sm:$0xff pattern:$0x75316420] }
   0xc   :  { %2284 = vmatpush.msk.msra.mxu2 %vm81_vm0, %v66_v8  ;;  %2285 = vmatpush.msk.msra.mxu3 %vm81_vm0, %v67_v9  ;;  %488 = vst [vmem:[#allocation1] ss:$2 sm:$0xff] %v35_v3  ;;  %v202_v20 = vld [vmem:[%s3728_s4 + $0x10] sm:$0xff]  ;;  %v205_v21 = vld [vmem:[%s3728_s4 + $0x28] sm:$0xff]  ;;  %v204_v24 = vld [vmem:[%s3728_s4 + $0x20] sm:$0xff] }
   0xd   :  { %56 = vperm.xlu0 %2288, %v42_v5   ;;  %46 = vperm.xlu1 %2289, %v40_v6   ;;  %v153_v22 = vld [vmem:[%s3727_s3 + $0x8] sm:$0xff]  ;;  %v154_v25 = vld [vmem:[%s3727_s3 + $0x10] sm:$0xff]  ;;  %v200_v26 = vld [vmem:[%s3728_s4] sm:$0xff] }
   0xe   :  { %2051 = vmatmul.msk.f32.vlgmr.msra.gmra.mxu2 %vm68_vm1, %v38_v7  ;;  %2056 = vmatmul.msk.f32.vlgmr.msra.gmra.mxu3 %vm68_vm1, %v38_v7  ;;  %v201_v23 = vld [vmem:[%s3728_s4 + $0x8] sm:$0xff]  ;;  %v212_v27 = vld [vmem:[%s3728_s4 + $0x60] sm:$0xff]  ;;  %v155_v28 = vld [vmem:[%s3727_s3 + $0x18] sm:$0xff] }
   0xf   :  { %2048 = vmatpush.msk.msra.mxu0 %vm81_vm0, %v66_v8  ;;  %2053 = vmatpush.msk.msra.mxu1 %vm81_vm0, %v67_v9  ;;  %v226_v29 = vld [vmem:[%s3728_s4 + $0xd0] sm:$0xff]  ;;  %v225_v30 = vld [vmem:[%s3728_s4 + $0xc8] sm:$0xff]  ;;  %v156_v31 = vld [vmem:[%s3727_s3 + $0x20] sm:$0xff] }
  0x10   :  { %2049 = vmatmul.msk.f32.vlgmr.msra.gmra.mxu0 %vm68_vm1, %v36_v10  ;;  %2054 = vmatmul.msk.f32.vlgmr.msra.gmra.mxu1 %vm68_vm1, %v36_v10  ;;  %v223_v32 = vld [vmem:[%s3728_s4 + $0xb8] sm:$0xff]  ;;  %v157_v34 = vld [vmem:[%s3727_s3 + $0x28] sm:$0xff]  ;;  %v218_v36 = vld [vmem:[%s3728_s4 + $0x90] sm:$0xff] }
  0x11   :  { %v219_v33 = vld [vmem:[%s3728_s4 + $0x98] sm:$0xff]  ;;  %v158_v37 = vld [vmem:[%s3727_s3 + $0x30] sm:$0xff]  ;;  %v217_v39 = vld [vmem:[%s3728_s4 + $0x88] sm:$0xff] }
  0x12   :  { %v231_v35 = vld [vmem:[%s3728_s4 + $0xf8] sm:$0xff]  ;;  %v230_v38 = vld [vmem:[%s3728_s4 + $0xf0] sm:$0xff]  ;;  %v229_v41 = vld [vmem:[%s3728_s4 + $0xe8] sm:$0xff] }
  0x13   :  { %v489_v14 = vld.sshfl [vmem:[#allocation1] sm:$0xff pattern:$0x75316420]  ;;  %v490_v15 = vld.sshfl [vmem:[#allocation1 + $0x8] sm:$0xff pattern:$0x75316420] }
  0x14   :  { %2058 = vmatpush.msk.msrb.mxu2 %vm81_vm0, %v489_v14  ;;  %2107 = vmatpush.msk.msrb.mxu3 %vm81_vm0, %v490_v15  ;;  %v159_v40 = vld [vmem:[%s3727_s3 + $0x38] sm:$0xff]  ;;  %v216_v42 = vld [vmem:[%s3728_s4 + $0x80] sm:$0xff]  ;;  %v242_v45 = vld [vmem:[%s3728_s4 + $0x150] sm:$0xff] }
  0x15   :  { %295 = vperm.xlu0 %2288, %v209_v11   ;;  %290 = vperm.xlu1 %2289, %v208_v12   ;;  %v160_v43 = vld [vmem:[%s3727_s3 + $0x40] sm:$0xff]  ;;  %v243_v44 = vld [vmem:[%s3728_s4 + $0x158] sm:$0xff]  ;;  %v161_v46 = vld [vmem:[%s3727_s3 + $0x48] sm:$0xff] }
  0x16   :  { %2052 = vmatmul.msk.f32.gmra.mxu2 %vm68_vm1, %v39_v13  ;;  %2057 = vmatmul.msk.f32.gmra.mxu3 %vm68_vm1, %v39_v13  ;;  %v211_v47 = vld [vmem:[%s3728_s4 + $0x58] sm:$0xff]  ;;  %v240_v48 = vld [vmem:[%s3728_s4 + $0x140] sm:$0xff]  ;;  %v162_v50 = vld [vmem:[%s3727_s3 + $0x50] sm:$0xff] }
  0x17   :  { %305 = vperm.xlu2 %2290, %v211_v47   ;;  %v232_v49 = vld [vmem:[%s3728_s4 + $0x100] sm:$0xff]  ;;  %v234_v51 = vld [vmem:[%s3728_s4 + $0x110] sm:$0xff]  ;;  %v235_v52 = vld [vmem:[%s3728_s4 + $0x118] sm:$0xff] }
  0x18   :  { %2050 = vmatmul.msk.f32.gmra.mxu0 %vm68_vm1, %v37_v16  ;;  %2055 = vmatmul.msk.f32.gmra.mxu1 %vm68_vm1, %v37_v16  ;;  %v163_v53 = vld [vmem:[%s3727_s3 + $0x58] sm:$0xff]  ;;  %v210_v54 = vld [vmem:[%s3728_s4 + $0x50] sm:$0xff]  ;;  %v237_v55 = vld [vmem:[%s3728_s4 + $0x128] sm:$0xff] }
  0x19   :  { %v238_v56 = vld [vmem:[%s3728_s4 + $0x130] sm:$0xff]  ;;  %v164_v57 = vld [vmem:[%s3727_s3 + $0x60] sm:$0xff]  ;;  %v207_v58 = vld [vmem:[%s3728_s4 + $0x38] sm:$0xff] }
  0x1a   :  { %v245_v59 = vld [vmem:[%s3728_s4 + $0x168] sm:$0xff]  ;;  %v239_v60 = vld [vmem:[%s3728_s4 + $0x138] sm:$0xff]  ;;  %v1962_v0 = vld [vmem:[%s3731_s7] sm:$0xff] }
  0x1b   :  { %v165_v61 = vld [vmem:[%s3727_s3 + $0x68] sm:$0xff]  ;;  %v215_v62 = vld [vmem:[%s3728_s4 + $0x78] sm:$0xff]  ;;  %v166_v1 = vld [vmem:[%s3727_s3 + $0x70] sm:$0xff] }
  0x1c   :  { %v247_v63 = vld [vmem:[%s3728_s4 + $0x178] sm:$0xff]  ;;  %v214_v2 = vld [vmem:[%s3728_s4 + $0x70] sm:$0xff]  ;;  %v213_v12 = vld [vmem:[%s3728_s4 + $0x68] sm:$0xff] }
  0x1d   :  { %265 = vperm.xlu0 %2288, %v203_v17   ;;  %280 = vperm.xlu1 %2289, %v206_v18   ;;  %v1964_v8 = vld [vmem:[%s3731_s7 + $0x10] sm:$0xff]  ;;  %v1965_v9 = vld [vmem:[%s3731_s7 + $0x18] sm:$0xff] }
  0x1e   :  { %2059 = vmatmul.msk.f32.vlgmr.msrb.gmra.mxu2 %vm68_vm1, %v152_v19  ;;  %2108 = vmatmul.msk.f32.vlgmr.msrb.gmra.mxu3 %vm68_vm1, %v152_v19  ;;  %v167_v11 = vld [vmem:[%s3727_s3 + $0x78] sm:$0xff]  ;;  %v963_v47 = vld [vmem:[%s3729_s5 + $0x10] sm:$0xff] }
  0x1f   :  { %300 = vperm.xlu2 %2290, %v210_v54  }
  0x25   :  { %260 = vperm.xlu0 %2288, %v202_v20   ;;  %275 = vperm.xlu1 %2289, %v205_v21  }
  0x26   :  { %2060 = vmatmul.msk.f32.gmra.mxu2 %vm68_vm1, %v153_v22  ;;  %2109 = vmatmul.msk.f32.gmra.mxu3 %vm68_vm1, %v153_v22  ;;  %v168_v22 = vld [vmem:[%s3727_s3 + $0x80] sm:$0xff] }
  0x27   :  { %285 = vperm.xlu2 %2290, %v207_v58   ;;  %v174_v58 = vld [vmem:[%s3727_s3 + $0xb0] sm:$0xff] }
  0x2d   :  { %255 = vperm.xlu0 %2288, %v201_v23   ;;  %270 = vperm.xlu1 %2289, %v204_v24   ;;  %v227_v24 = vld [vmem:[%s3728_s4 + $0xd8] sm:$0xff] }
  0x2e   :  { %2061 = vmatmul.msk.f32.gmra.mxu2 %vm68_vm1, %v154_v25  ;;  %2110 = vmatmul.msk.f32.gmra.mxu3 %vm68_vm1, %v154_v25 }
  0x2f   :  { %325 = vperm.xlu2 %2290, %v215_v62   ;;  %v966_v62 = vld [vmem:[%s3729_s5 + $0x28] sm:$0xff] }
  0x35   :  { %250 = vperm.xlu0 %2288, %v200_v26   ;;  %310 = vperm.xlu1 %2289, %v212_v27  }
  0x36   :  { %2062 = vmatmul.msk.f32.gmra.mxu2 %vm68_vm1, %v155_v28  ;;  %2111 = vmatmul.msk.f32.gmra.mxu3 %vm68_vm1, %v155_v28 }
  0x37   :  { %320 = vperm.xlu2 %2290, %v214_v2  }
  0x3d   :  { %380 = vperm.xlu0 %2288, %v226_v29   ;;  %375 = vperm.xlu1 %2289, %v225_v30  }
  0x3e   :  { %2063 = vmatmul.msk.f32.gmra.mxu2 %vm68_vm1, %v156_v31  ;;  %2112 = vmatmul.msk.f32.gmra.mxu3 %vm68_vm1, %v156_v31  ;;  %v169_v31 = vld [vmem:[%s3727_s3 + $0x88] sm:$0xff] }
  0x3f   :  { %315 = vperm.xlu2 %2290, %v213_v12   ;;  %v178_v12 = vld [vmem:[%s3727_s3 + $0xd0] sm:$0xff] }
  0x45   :  { %365 = vperm.xlu0 %2288, %v223_v32   ;;  %345 = vperm.xlu1 %2289, %v219_v33  }
  0x46   :  { %2064 = vmatmul.msk.f32.gmra.mxu2 %vm68_vm1, %v157_v34  ;;  %2113 = vmatmul.msk.f32.gmra.mxu3 %vm68_vm1, %v157_v34  ;;  %v224_v34 = vld [vmem:[%s3728_s4 + $0xc0] sm:$0xff] }
  0x47   :  { %385 = vperm.xlu2 %2290, %v227_v24   ;;  %v972_v24 = vld [vmem:[%s3729_s5 + $0x58] sm:$0xff] }
  0x4d   :  { %405 = vperm.xlu0 %2288, %v231_v35   ;;  %340 = vperm.xlu1 %2289, %v218_v36  }
  0x4e   :  { %2065 = vmatmul.msk.f32.gmra.mxu2 %vm68_vm1, %v158_v37  ;;  %2114 = vmatmul.msk.f32.gmra.mxu3 %vm68_vm1, %v158_v37  ;;  %v961_v37 = vld [vmem:[%s3729_s5] sm:$0xff] }
  0x4f   :  { %370 = vperm.xlu2 %2290, %v224_v34   ;;  %v182_v34 = vld [vmem:[%s3727_s3 + $0xf0] sm:$0xff] }
  0x55   :  { %400 = vperm.xlu0 %2288, %v230_v38   ;;  %335 = vperm.xlu1 %2289, %v217_v39  }
  0x56   :  { %2066 = vmatmul.msk.f32.gmra.mxu2 %vm68_vm1, %v159_v40  ;;  %2115 = vmatmul.msk.f32.gmra.mxu3 %vm68_vm1, %v159_v40  ;;  %v170_v40 = vld [vmem:[%s3727_s3 + $0x90] sm:$0xff] }
  0x5d   :  { %395 = vperm.xlu0 %2288, %v229_v41   ;;  %330 = vperm.xlu1 %2289, %v216_v42   ;;  %v222_v41 = vld [vmem:[%s3728_s4 + $0xb0] sm:$0xff]  ;;  %v962_v42 = vld [vmem:[%s3729_s5 + $0x8] sm:$0xff] }
  0x5e   :  { %2067 = vmatmul.msk.f32.gmra.mxu2 %vm68_vm1, %v160_v43  ;;  %2116 = vmatmul.msk.f32.gmra.mxu3 %vm68_vm1, %v160_v43 }
  0x5f   :  { %360 = vperm.xlu2 %2290, %v222_v41  }
  0x65   :  { %465 = vperm.xlu0 %2288, %v243_v44   ;;  %460 = vperm.xlu1 %2289, %v242_v45   ;;  %v171_v45 = vld [vmem:[%s3727_s3 + $0x98] sm:$0xff] }
  0x66   :  { %2068 = vmatmul.msk.f32.gmra.mxu2 %vm68_vm1, %v161_v46  ;;  %2117 = vmatmul.msk.f32.gmra.mxu3 %vm68_vm1, %v161_v46  ;;  %v221_v46 = vld [vmem:[%s3728_s4 + $0xa8] sm:$0xff] }
  0x67   :  { %355 = vperm.xlu2 %2290, %v221_v46  }
  0x6d   :  { %450 = vperm.xlu0 %2288, %v240_v48   ;;  %410 = vperm.xlu1 %2289, %v232_v49  }
  0x6e   :  { %2069 = vmatmul.msk.f32.gmra.mxu2 %vm68_vm1, %v162_v50  ;;  %2118 = vmatmul.msk.f32.gmra.mxu3 %vm68_vm1, %v162_v50  ;;  %v172_v50 = vld [vmem:[%s3727_s3 + $0xa0] sm:$0xff] }
  0x75   :  { %420 = vperm.xlu0 %2288, %v234_v51   ;;  %425 = vperm.xlu1 %2289, %v235_v52   ;;  %v220_v51 = vld [vmem:[%s3728_s4 + $0xa0] sm:$0xff]  ;;  %v964_v52 = vld [vmem:[%s3729_s5 + $0x18] sm:$0xff] }
  0x76   :  { %2070 = vmatmul.msk.f32.gmra.mxu2 %vm68_vm1, %v163_v53  ;;  %2119 = vmatmul.msk.f32.gmra.mxu3 %vm68_vm1, %v163_v53  ;;  %v173_v53 = vld [vmem:[%s3727_s3 + $0xa8] sm:$0xff] }
  0x77   :  { %v62_v3 = vpop.permute.xlu0 %61  ;;  %v52_v10 = vpop.permute.xlu1 %51  ;;  %350 = vperm.xlu2 %2290, %v220_v51  }
  0x7d   :  { %435 = vperm.xlu0 %2288, %v237_v55   ;;  %440 = vperm.xlu1 %2289, %v238_v56   ;;  %v228_v56 = vld [vmem:[%s3728_s4 + $0xe0] sm:$0xff] }
  0x7e   :  { %2071 = vmatmul.msk.f32.gmra.mxu2 %vm68_vm1, %v164_v57  ;;  %2120 = vmatmul.msk.f32.gmra.mxu3 %vm68_vm1, %v164_v57  ;;  %v965_v57 = vld [vmem:[%s3729_s5 + $0x20] sm:$0xff] }
  0x7f   :  { %v57_v13 = vpop.permute.xlu0 %56  ;;  %v47_v25 = vpop.permute.xlu1 %46  ;;  %390 = vperm.xlu2 %2290, %v228_v56   ;;  %v186_v56 = vld [vmem:[%s3727_s3 + $0x110] sm:$0xff] }
  0x85   :  { %475 = vperm.xlu0 %2288, %v245_v59   ;;  %445 = vperm.xlu1 %2289, %v239_v60   ;;  %v241_v59 = vld [vmem:[%s3728_s4 + $0x148] sm:$0xff] }
  0x86   :  { %2072 = vmatmul.msk.f32.gmra.mxu2 %vm68_vm1, %v165_v61  ;;  %2121 = vmatmul.msk.f32.gmra.mxu3 %vm68_vm1, %v165_v61 }
  0x87   :  { %455 = vperm.xlu2 %2290, %v241_v59  }
  0x8d   :  { %485 = vperm.xlu0 %2288, %v247_v63   ;;  %1968 = vperm.xlu1 %2289, %v1962_v0   ;;  %v103_v4 = vpop.f32.mrf.mxu0  ;;  %v132_v5 = vpop.f32.mrf.mxu1  ;;  %v175_v63 = vld [vmem:[%s3727_s3 + $0xb8] sm:$0xff]  ;;  %v233_v0 = vld [vmem:[%s3728_s4 + $0x108] sm:$0xff] }
  0x8e   :  { %2073 = vmatmul.msk.f32.gmra.mxu2 %vm68_vm1, %v166_v1  ;;  %2122 = vmatmul.msk.f32.gmra.mxu3 %vm68_vm1, %v166_v1  ;;  %v104_v27 = vadd.f32 %v103_v4, %v47_v25  ;;  %v133_v28 = vadd.f32 %v132_v5, %v47_v25  ;;  %v967_v1 = vld [vmem:[%s3729_s5 + $0x30] sm:$0xff]  ;;  %v176_v4 = vld [vmem:[%s3727_s3 + $0xc0] sm:$0xff] }
  0x8f   :  { %415 = vperm.xlu2 %2290, %v233_v0   ;;  %v236_v5 = vld [vmem:[%s3728_s4 + $0x120] sm:$0xff] }
  0x91   :  { %v109_v6 = vpop.f32.mrf.mxu2  ;;  %v138_v7 = vpop.f32.mrf.mxu3 }
  0x92   :  { %v110_v17 = vadd.f32 %v109_v6, %v57_v13  ;;  %v139_v21 = vadd.f32 %v138_v7, %v57_v13  ;;  %v968_v6 = vld [vmem:[%s3729_s5 + $0x38] sm:$0xff] }
  0x95   :  { %1978 = vperm.xlu0 %2288, %v1964_v8   ;;  %1983 = vperm.xlu1 %2289, %v1965_v9   ;;  %v106_v14 = vpop.f32.mrf.mxu0  ;;  %v135_v18 = vpop.f32.mrf.mxu1  ;;  %v177_v9 = vld [vmem:[%s3727_s3 + $0xc8] sm:$0xff] }
  0x96   :  { %2074 = vmatmul.msk.f32.gmra.mxu2 %vm68_vm1, %v167_v11  ;;  %2123 = vmatmul.msk.f32.gmra.mxu3 %vm68_vm1, %v167_v11  ;;  %v107_v23 = vadd.f32 %v106_v14, %v52_v10  ;;  %v136_v26 = vadd.f32 %v135_v18, %v52_v10  ;;  %v244_v10 = vld [vmem:[%s3728_s4 + $0x160] sm:$0xff]  ;;  %v1963_v18 = vld [vmem:[%s3731_s7 + $0x8] sm:$0xff] }
  0x97   :  { %430 = vperm.xlu2 %2290, %v236_v5   ;;  %v969_v11 = vld [vmem:[%s3729_s5 + $0x40] sm:$0xff] }
  0x99   :  { %v112_v15 = vpop.f32.mrf.mxu2  ;;  %v141_v16 = vpop.f32.mrf.mxu3 }
  0x9a   :  { %v113_v19 = vadd.f32 %v112_v15, %v62_v3  ;;  %v142_v20 = vadd.f32 %v141_v16, %v62_v3  ;;  %v246_v15 = vld [vmem:[%s3728_s4 + $0x170] sm:$0xff]  ;;  %v970_v16 = vld [vmem:[%s3729_s5 + $0x48] sm:$0xff] }
  0x9c   :  { %2291 = vtanh.f32 %v113_v19 }
  0x9d   :  { %2293 = vtanh.f32 %v142_v20 }
  0x9e   :  { %2295 = vtanh.f32 %v110_v17  ;;  %2075 = vmatmul.msk.f32.gmra.mxu2 %vm68_vm1, %v168_v22  ;;  %2124 = vmatmul.msk.f32.gmra.mxu3 %vm68_vm1, %v168_v22  ;;  %v179_v17 = vld [vmem:[%s3727_s3 + $0xd8] sm:$0xff]  ;;  %v180_v22 = vld [vmem:[%s3727_s3 + $0xe0] sm:$0xff] }
  0x9f   :  { %2297 = vtanh.f32 %v139_v21  ;;  %470 = vperm.xlu2 %2290, %v244_v10   ;;  %v971_v21 = vld [vmem:[%s3729_s5 + $0x50] sm:$0xff] }
  0xa0   :  { %2299 = vtanh.f32 %v107_v23  ;;  %v2012_v23 = vld [vmem:[#allocation2] sm:$0x1] }
  0xa1   :  { %2301 = vtanh.f32 %v136_v26  ;;  %v2877_v43 = vpop.f32.mrf.mxu2  ;;  %v2879_v44 = vpop.f32.mrf.mxu3 }
  0xa2   :  { %v2829_v29 = vpop.eup %2291  ;;  %2303 = vtanh.f32 %v104_v27  ;;  %v181_v27 = vld [vmem:[%s3727_s3 + $0xe8] sm:$0xff] }
  0xa3   :  { %v2831_v30 = vpop.eup %2293  ;;  %2305 = vtanh.f32 %v133_v28  ;;  %1022 = vmatpush.msrb.mxu0 %v2829_v29 }
  0xa4   :  { %v2837_v32 = vpop.eup %2295  ;;  %1075 = vmatpush.msrb.mxu1 %v2831_v30 }
  0xa5   :  { %v2840_v33 = vpop.eup %2297  ;;  %1023 = vmatpush.msrb.mxu0 %v2837_v32 }
  0xa6   :  { %v2846_v35 = vpop.eup %2299  ;;  %1076 = vmatpush.msrb.mxu1 %v2840_v33  ;;  %2076 = vmatmul.msk.f32.gmra.mxu2 %vm68_vm1, %v169_v31 }
  0xa7   :  { %v2850_v36 = vpop.eup %2301  ;;  %2125 = vmatmul.msk.f32.gmra.mxu3 %vm68_vm1, %v169_v31  ;;  %1024 = vmatpush.msrb.mxu0 %v2846_v35 }
  0xa8   :  { %v2857_v38 = vpop.eup %2303  ;;  %1077 = vmatpush.msrb.mxu1 %v2850_v36  ;;  %480 = vperm.xlu2 %2290, %v246_v15  }
  0xa9   :  { %v2860_v39 = vpop.eup %2305  ;;  %1025 = vmatpush.msrb.mxu0 %v2857_v38  ;;  %v2894_v48 = vpop.f32.mrf.mxu2 }
  0xaa   :  { %1078 = vmatpush.msrb.mxu1 %v2860_v39  ;;  %2156 = vmatmul.msk.f32.vlgmr.msrb.gmra.mxu0 %vm973_vm2, %v961_v37  ;;  %v2897_v49 = vpop.f32.mrf.mxu3 }
  0xab   :  { %2168 = vmatmul.msk.f32.vlgmr.msrb.gmra.mxu1 %vm973_vm2, %v961_v37  ;;  %v183_v37 = vld [vmem:[%s3727_s3 + $0xf8] sm:$0xff] }
  0xae   :  { %2077 = vmatmul.msk.f32.gmra.mxu2 %vm68_vm1, %v170_v40 }
  0xaf   :  { %2126 = vmatmul.msk.f32.gmra.mxu3 %vm68_vm1, %v170_v40 }
  0xb0   :  { %1973 = vperm.xlu2 %2290, %v1963_v18   ;;  %v190_v18 = vld [vmem:[%s3727_s3 + $0x130] sm:$0xff] }
  0xb1   :  { %v2916_v54 = vpop.f32.mrf.mxu2 }
  0xb2   :  { %2157 = vmatmul.msk.f32.gmra.mxu0 %vm973_vm2, %v962_v42  ;;  %v2918_v55 = vpop.f32.mrf.mxu3 }
  0xb3   :  { %2169 = vmatmul.msk.f32.gmra.mxu1 %vm973_vm2, %v962_v42  ;;  %v184_v42 = vld [vmem:[%s3727_s3 + $0x100] sm:$0xff] }
  0xb6   :  { %2078 = vmatmul.msk.f32.gmra.mxu2 %vm68_vm1, %v171_v45 }
  0xb7   :  { %2127 = vmatmul.msk.f32.gmra.mxu3 %vm68_vm1, %v171_v45 }
  0xb8   :  { %2015 = vperm.xlu2 %2290, %v2012_v23  }
  0xb9   :  { %v2936_v60 = vpop.f32.mrf.mxu2 }
  0xba   :  { %2158 = vmatmul.msk.f32.gmra.mxu0 %vm973_vm2, %v963_v47  ;;  %3734 = vst [vmem:[#allocation6_spill] sm:$0xff] %v2936_v60  ;;  %v2939_v61 = vpop.f32.mrf.mxu3  ;;  %v296_v60 = vpop.permute.xlu0 %295 }
  0xbb   :  { %2170 = vmatmul.msk.f32.gmra.mxu1 %vm973_vm2, %v963_v47  ;;  %3735 = vst [vmem:[#allocation7_spill] sm:$0xff] %v2939_v61  ;;  %v185_v47 = vld [vmem:[%s3727_s3 + $0x108] sm:$0xff]  ;;  %v196_v61 = vld [vmem:[%s3727_s3 + $0x160] sm:$0xff] }
  0xbe   :  { %2079 = vmatmul.msk.f32.gmra.mxu2 %vm68_vm1, %v172_v50 }
  0xbf   :  { %2128 = vmatmul.msk.f32.gmra.mxu3 %vm68_vm1, %v172_v50 }
  0xc1   :  { %v2958_v2 = vpop.f32.mrf.mxu2 }
  0xc2   :  { %2159 = vmatmul.msk.f32.gmra.mxu0 %vm973_vm2, %v964_v52  ;;  %v2960_v3 = vpop.f32.mrf.mxu3 }
  0xc3   :  { %2171 = vmatmul.msk.f32.gmra.mxu1 %vm973_vm2, %v964_v52 }
  0xc6   :  { %2080 = vmatmul.msk.f32.gmra.mxu2 %vm68_vm1, %v173_v53 }
  0xc7   :  { %2129 = vmatmul.msk.f32.gmra.mxu3 %vm68_vm1, %v173_v53 }
  0xc9   :  { %v2975_v7 = vpop.f32.mrf.mxu2 }
  0xca   :  { %2160 = vmatmul.msk.f32.gmra.mxu0 %vm973_vm2, %v965_v57  ;;  %v2978_v8 = vpop.f32.mrf.mxu3 }
  0xcb   :  { %2172 = vmatmul.msk.f32.gmra.mxu1 %vm973_vm2, %v965_v57 }
  0xce   :  { %2081 = vmatmul.msk.f32.gmra.mxu2 %vm68_vm1, %v174_v58 }
  0xcf   :  { %2130 = vmatmul.msk.f32.gmra.mxu3 %vm68_vm1, %v174_v58 }
  0xd1   :  { %v2997_v13 = vpop.f32.mrf.mxu2 }
  0xd2   :  { %2161 = vmatmul.msk.f32.gmra.mxu0 %vm973_vm2, %v966_v62  ;;  %v2999_v14 = vpop.f32.mrf.mxu3 }
  0xd3   :  { %2173 = vmatmul.msk.f32.gmra.mxu1 %vm973_vm2, %v966_v62 }
  0xd6   :  { %2082 = vmatmul.msk.f32.gmra.mxu2 %vm68_vm1, %v175_v63 }
  0xd7   :  { %2131 = vmatmul.msk.f32.gmra.mxu3 %vm68_vm1, %v175_v63  ;;  %v187_v63 = vld [vmem:[%s3727_s3 + $0x118] sm:$0xff] }
  0xd9   :  { %v3017_v19 = vpop.f32.mrf.mxu2 }
  0xda   :  { %2162 = vmatmul.msk.f32.gmra.mxu0 %vm973_vm2, %v967_v1  ;;  %3736 = vst [vmem:[#allocation8_spill] sm:$0xff] %v3017_v19  ;;  %v3020_v20 = vpop.f32.mrf.mxu3 }
  0xdb   :  { %2174 = vmatmul.msk.f32.gmra.mxu1 %vm973_vm2, %v967_v1  ;;  %3737 = vst [vmem:[#allocation9_spill] sm:$0xff] %v3020_v20 }
  0xde   :  { %2083 = vmatmul.msk.f32.gmra.mxu2 %vm68_vm1, %v176_v4 }
  0xdf   :  { %2132 = vmatmul.msk.f32.gmra.mxu3 %vm68_vm1, %v176_v4  ;;  %v188_v4 = vld [vmem:[%s3727_s3 + $0x120] sm:$0xff] }
  0xe1   :  { %v3036_v25 = vpop.f32.mrf.mxu2 }
  0xe2   :  { %2163 = vmatmul.msk.f32.gmra.mxu0 %vm973_vm2, %v968_v6  ;;  %v3038_v26 = vpop.f32.mrf.mxu3 }
  0xe3   :  { %2175 = vmatmul.msk.f32.gmra.mxu1 %vm973_vm2, %v968_v6 }
  0xe6   :  { %2084 = vmatmul.msk.f32.gmra.mxu2 %vm68_vm1, %v177_v9 }
  0xe7   :  { %2133 = vmatmul.msk.f32.gmra.mxu3 %vm68_vm1, %v177_v9 }
  0xe9   :  { %v3047_v28 = vpop.f32.mrf.mxu2 }
  0xea   :  { %2164 = vmatmul.msk.f32.gmra.mxu0 %vm973_vm2, %v969_v11  ;;  %v3049_v31 = vpop.f32.mrf.mxu3  ;;  %v684_v20 = vadd.f32 %v3047_v28, %v296_v60 }
  0xeb   :  { %2176 = vmatmul.msk.f32.gmra.mxu1 %vm973_vm2, %v969_v11  ;;  %v189_v11 = vld [vmem:[%s3727_s3 + $0x128] sm:$0xff] }
  0xee   :  { %2085 = vmatmul.msk.f32.gmra.mxu2 %vm68_vm1, %v178_v12 }
  0xef   :  { %2134 = vmatmul.msk.f32.gmra.mxu3 %vm68_vm1, %v178_v12 }
  0xf1   :  { %v3059_v40 = vpop.f32.mrf.mxu2 }
  0xf2   :  { %2165 = vmatmul.msk.f32.gmra.mxu0 %vm973_vm2, %v970_v16  ;;  %v3061_v41 = vpop.f32.mrf.mxu3 }
  0xf3   :  { %2177 = vmatmul.msk.f32.gmra.mxu1 %vm973_vm2, %v970_v16 }
  0xf6   :  { %2086 = vmatmul.msk.f32.gmra.mxu2 %vm68_vm1, %v179_v17 }
  0xf7   :  { %2135 = vmatmul.msk.f32.gmra.mxu3 %vm68_vm1, %v179_v17 }
  0xf9   :  { %v3068_v45 = vpop.f32.mrf.mxu2 }
  0xfa   :  { %2166 = vmatmul.msk.f32.gmra.mxu0 %vm973_vm2, %v971_v21  ;;  %v3071_v46 = vpop.f32.mrf.mxu3 }
  0xfb   :  { %2178 = vmatmul.msk.f32.gmra.mxu1 %vm973_vm2, %v971_v21 }
  0xfe   :  { %2087 = vmatmul.msk.f32.gmra.mxu2 %vm68_vm1, %v180_v22 }
  0xff   :  { %2136 = vmatmul.msk.f32.gmra.mxu3 %vm68_vm1, %v180_v22 }
 0x101   :  { %v3081_v51 = vpop.f32.mrf.mxu2 }
 0x102   :  { %2167 = vmatmul.msk.f32.gmra.mxu0 %vm973_vm2, %v972_v24  ;;  %v3085_v53 = vpop.f32.mrf.mxu3 }
 0x103   :  { %2179 = vmatmul.msk.f32.gmra.mxu1 %vm973_vm2, %v972_v24 }
 0x106   :  { %2088 = vmatmul.msk.f32.gmra.mxu2 %vm68_vm1, %v181_v27 }
 0x107   :  { %2137 = vmatmul.msk.f32.gmra.mxu3 %vm68_vm1, %v181_v27  ;;  %v191_v27 = vld [vmem:[%s3727_s3 + $0x138] sm:$0xff] }
 0x109   :  { %v3096_v59 = vpop.f32.mrf.mxu2 }
 0x10a   :  { %v3098_v62 = vpop.f32.mrf.mxu3 }
 0x10e   :  { %2089 = vmatmul.msk.f32.gmra.mxu2 %vm68_vm1, %v182_v34 }
 0x10f   :  { %2138 = vmatmul.msk.f32.gmra.mxu3 %vm68_vm1, %v182_v34 }
 0x111   :  { %v3112_v5 = vpop.f32.mrf.mxu2 }
 0x112   :  { %3738 = vst [vmem:[#allocation10_spill] sm:$0xff] %v3112_v5  ;;  %v3114_v6 = vpop.f32.mrf.mxu3 }
 0x113   :  { %3739 = vst [vmem:[#allocation11_spill] sm:$0xff] %v3114_v6 }
 0x116   :  { %2090 = vmatmul.msk.f32.gmra.mxu2 %vm68_vm1, %v183_v37 }
 0x117   :  { %2139 = vmatmul.msk.f32.gmra.mxu3 %vm68_vm1, %v183_v37 }
 0x119   :  { %v3125_v12 = vpop.f32.mrf.mxu2 }
 0x11a   :  { %3742 = vst [vmem:[#allocation14_spill] sm:$0xff] %v3125_v12  ;;  %v3128_v15 = vpop.f32.mrf.mxu3 }
 0x11b   :  { %3743 = vst [vmem:[#allocation15_spill] sm:$0xff] %v3128_v15 }
 0x11e   :  { %2091 = vmatmul.msk.f32.gmra.mxu2 %vm68_vm1, %v184_v42 }
 0x11f   :  { %2140 = vmatmul.msk.f32.gmra.mxu3 %vm68_vm1, %v184_v42 }
 0x121   :  { %v3142_v22 = vpop.f32.mrf.mxu2 }
 0x122   :  { %3744 = vst [vmem:[#allocation16_spill] sm:$0xff] %v3142_v22  ;;  %v3146_v24 = vpop.f32.mrf.mxu3 }
 0x123   :  { %3745 = vst [vmem:[#allocation17_spill] sm:$0xff] %v3146_v24  ;;  %v306_v24 = vpop.permute.xlu2 %305 }
 0x126   :  { %2092 = vmatmul.msk.f32.gmra.mxu2 %vm68_vm1, %v185_v47 }
 0x127   :  { %2141 = vmatmul.msk.f32.gmra.mxu3 %vm68_vm1, %v185_v47  ;;  %v3079_v50 = vpop.f32.mrf.mxu0 }
 0x128   :  { %v3083_v52 = vpop.f32.mrf.mxu1 }
 0x129   :  { %v3157_v42 = vpop.f32.mrf.mxu2 }
 0x12a   :  { %3746 = vst [vmem:[#allocation18_spill] sm:$0xff] %v3157_v42  ;;  %v3159_v47 = vpop.f32.mrf.mxu3 }
 0x12b   :  { %3747 = vst [vmem:[#allocation19_spill] sm:$0xff] %v3159_v47  ;;  %v301_v12 = vpop.permute.xlu2 %300 }
 0x12e   :  { %2093 = vmatmul.msk.f32.gmra.mxu2 %vm68_vm1, %v186_v56 }
 0x12f   :  { %2142 = vmatmul.msk.f32.gmra.mxu3 %vm68_vm1, %v186_v56  ;;  %v3092_v57 = vpop.f32.mrf.mxu0  ;;  %v192_v56 = vld [vmem:[%s3727_s3 + $0x140] sm:$0xff] }
 0x130   :  { %v3094_v58 = vpop.f32.mrf.mxu1 }
 0x136   :  { %2094 = vmatmul.msk.f32.gmra.mxu2 %vm68_vm1, %v187_v63 }
 0x137   :  { %2143 = vmatmul.msk.f32.gmra.mxu3 %vm68_vm1, %v187_v63  ;;  %v3105_v0 = vpop.f32.mrf.mxu0 }
 0x138   :  { %v3107_v1 = vpop.f32.mrf.mxu1 }
 0x13e   :  { %2095 = vmatmul.msk.f32.gmra.mxu2 %vm68_vm1, %v188_v4 }
 0x13f   :  { %2144 = vmatmul.msk.f32.gmra.mxu3 %vm68_vm1, %v188_v4  ;;  %v3118_v9 = vpop.f32.mrf.mxu0 }
 0x140   :  { %3740 = vst [vmem:[#allocation12_spill] sm:$0xff] %v3118_v9  ;;  %v3120_v10 = vpop.f32.mrf.mxu1 }
 0x141   :  { %3741 = vst [vmem:[#allocation13_spill] sm:$0xff] %v3120_v10 }
 0x146   :  { %2096 = vmatmul.msk.f32.gmra.mxu2 %vm68_vm1, %v189_v11 }
 0x147   :  { %2145 = vmatmul.msk.f32.gmra.mxu3 %vm68_vm1, %v189_v11  ;;  %v3131_v16 = vpop.f32.mrf.mxu0  ;;  %v193_v11 = vld [vmem:[%s3727_s3 + $0x148] sm:$0xff] }
 0x148   :  { %v3133_v17 = vpop.f32.mrf.mxu1 }
 0x14e   :  { %2097 = vmatmul.msk.f32.gmra.mxu2 %vm68_vm1, %v190_v18 }
 0x14f   :  { %2146 = vmatmul.msk.f32.gmra.mxu3 %vm68_vm1, %v190_v18  ;;  %v3140_v21 = vpop.f32.mrf.mxu0  ;;  %v3173_v18 = vpop.f32.mrf.mxu2 }
 0x150   :  { %v3144_v23 = vpop.f32.mrf.mxu1  ;;  %3750 = vst [vmem:[#allocation22_spill] sm:$0xff] %v3173_v18 }
 0x156   :  { %2098 = vmatmul.msk.f32.gmra.mxu2 %vm68_vm1, %v191_v27 }
 0x157   :  { %2147 = vmatmul.msk.f32.gmra.mxu3 %vm68_vm1, %v191_v27  ;;  %v3153_v34 = vpop.f32.mrf.mxu0  ;;  %v3175_v27 = vpop.f32.mrf.mxu3 }
 0x158   :  { %v3155_v37 = vpop.f32.mrf.mxu1  ;;  %3751 = vst [vmem:[#allocation23_spill] sm:$0xff] %v3175_v27  ;;  %v3182_v22 = vpop.f32.mrf.mxu2 }
 0x159   :  { %3752 = vst [vmem:[#allocation24_spill] sm:$0xff] %v3182_v22  ;;  %v687_v22 = vadd.f32 %v3059_v40, %v301_v12  ;;  %v291_v40 = vpop.permute.xlu1 %290 }
 0x15a   :  { %v842_v28 = vadd.f32 %v3038_v26, %v291_v40 }
 0x15e   :  { %2099 = vmatmul.msk.f32.gmra.mxu2 %vm68_vm1, %v192_v56 }
 0x15f   :  { %2148 = vmatmul.msk.f32.gmra.mxu3 %vm68_vm1, %v192_v56  ;;  %v3166_v63 = vpop.f32.mrf.mxu0  ;;  %v194_v56 = vld [vmem:[%s3727_s3 + $0x150] sm:$0xff]  ;;  %v3185_v15 = vpop.f32.mrf.mxu3 }
 0x160   :  { %3748 = vst [vmem:[#allocation20_spill] sm:$0xff] %v3166_v63  ;;  %v3168_v4 = vpop.f32.mrf.mxu1  ;;  %v3194_v9 = vpop.f32.mrf.mxu2 }
 0x161   :  { %3749 = vst [vmem:[#allocation21_spill] sm:$0xff] %v3168_v4 }
 0x162   :  { %3753 = vst [vmem:[#allocation25_spill] sm:$0xff] %v3185_v15  ;;  %v848_v15 = vadd.f32 %v3061_v41, %v301_v12  ;;  %v851_v41 = vadd.f32 %v3071_v46, %v306_v24 }
 0x163   :  { %3754 = vst [vmem:[#allocation26_spill] sm:$0xff] %v3194_v9  ;;  %v845_v9 = vadd.f32 %v3049_v31, %v296_v60 }
 0x166   :  { %2100 = vmatmul.msk.f32.gmra.mxu2 %vm68_vm1, %v193_v11 }
 0x167   :  { %2149 = vmatmul.msk.f32.gmra.mxu3 %vm68_vm1, %v193_v11  ;;  %v1051_v47 = vpop.f32.mrf.mxu0  ;;  %v195_v11 = vld [vmem:[%s3727_s3 + $0x158] sm:$0xff] }
 0x168   :  { %v1104_v42 = vpop.f32.mrf.mxu1 }
 0x169   :  { %v1133_v31 = vadd.f32 %v1104_v42, %v842_v28 }
 0x16e   :  { %2101 = vmatmul.msk.f32.gmra.mxu2 %vm68_vm1, %v194_v56 }
 0x16f   :  { %2150 = vmatmul.msk.f32.gmra.mxu3 %vm68_vm1, %v194_v56  ;;  %v1054_v27 = vpop.f32.mrf.mxu0  ;;  %v3197_v56 = vpop.f32.mrf.mxu3 }
 0x170   :  { %v1107_v18 = vpop.f32.mrf.mxu1  ;;  %3755 = vst [vmem:[#allocation27_spill] sm:$0xff] %v3197_v56  ;;  %v681_v56 = vadd.f32 %v3036_v25, %v291_v40  ;;  %v1134_v5 = vadd.f32 %v1054_v27, %v684_v20 }
 0x172   :  { %v1132_v19 = vadd.f32 %v1051_v47, %v681_v56 }
 0x176   :  { %2102 = vmatmul.msk.f32.gmra.mxu2 %vm68_vm1, %v195_v11 }
 0x177   :  { %2151 = vmatmul.msk.f32.gmra.mxu3 %vm68_vm1, %v195_v11  ;;  %v1057_v10 = vpop.f32.mrf.mxu0  ;;  %v690_v11 = vadd.f32 %v3068_v45, %v306_v24  ;;  %v3212_v60 = vpop.f32.mrf.mxu3 }
 0x178   :  { %v1110_v4 = vpop.f32.mrf.mxu1  ;;  %v1136_v63 = vadd.f32 %v1057_v10, %v687_v22  ;;  %v1135_v22 = vadd.f32 %v1107_v18, %v845_v9 }
 0x179   :  { %v1137_v6 = vadd.f32 %v1110_v4, %v848_v15  ;;  %v3210_v4 = vpop.f32.mrf.mxu2 }
 0x17a   :  { %2307 = vtanh.f32 %v1136_v63 }
 0x17b   :  { %2309 = vtanh.f32 %v1137_v6 }
 0x17e   :  { %2103 = vmatmul.msk.f32.gmra.mxu2 %vm68_vm1, %v196_v61 }
 0x17f   :  { %2152 = vmatmul.msk.f32.gmra.mxu3 %vm68_vm1, %v196_v61  ;;  %v1060_v12 = vpop.f32.mrf.mxu0  ;;  %v197_v61 = vld [vmem:[%s3727_s3 + $0x168] sm:$0xff]  ;;  %v3228_v56 = vpop.f32.mrf.mxu3 }
 0x180   :  { %v1138_v10 = vadd.f32 %v1060_v12, %v690_v11  ;;  %v1113_v15 = vpop.f32.mrf.mxu1  ;;  %v2308_v20 = vpop.eup %2307  ;;  %v1164_v12 = vld [vmem:[%s3730_s6] sm:$0xff] }
 0x181   :  { %v1139_v45 = vadd.f32 %v1113_v15, %v851_v41  ;;  %v2310_v25 = vpop.eup %2309  ;;  %v3225_v63 = vpop.f32.mrf.mxu2  ;;  %v199_v15 = vld [vmem:[%s3727_s3 + $0x178] sm:$0xff] }
 0x182   :  { %2311 = vtanh.f32 %v1138_v10  ;;  %v1173_v18 = vmul.f32 %v2310_v25, %v2840_v33  ;;  %v281_v25 = vpop.permute.xlu1 %280 }
 0x183   :  { %2313 = vtanh.f32 %v1139_v45  ;;  %v1165_v45 = vld [vmem:[%s3730_s6 + $0x8] sm:$0xff] }
 0x184   :  { %2315 = vtanh.f32 %v1134_v5  ;;  %v1172_v5 = vmul.f32 %v2308_v20, %v2837_v32  ;;  %v3265_v20 = vpop.permute.xlu0 %265 }
 0x185   :  { %2317 = vtanh.f32 %v1135_v22 }
 0x186   :  { %2319 = vtanh.f32 %v1132_v19  ;;  %2104 = vmatmul.msk.f32.gmra.mxu2 %vm68_vm1, %v197_v61  ;;  %v198_v19 = vld [vmem:[%s3727_s3 + $0x170] sm:$0xff] }
 0x187   :  { %2321 = vtanh.f32 %v1133_v31  ;;  %2153 = vmatmul.msk.f32.gmra.mxu3 %vm68_vm1, %v197_v61  ;;  %v3247_v22 = vpop.f32.mrf.mxu3  ;;  %v1166_v31 = vld [vmem:[%s3730_s6 + $0x10] sm:$0xff]  ;;  %v1167_v61 = vld [vmem:[%s3730_s6 + $0x18] sm:$0xff] }
 0x188   :  { %v2312_v26 = vpop.eup %2311 }
 0x189   :  { %v2314_v46 = vpop.eup %2313  ;;  %v1174_v6 = vmul.f32 %v2312_v26, %v2829_v29  ;;  %v3244_v28 = vpop.f32.mrf.mxu2 }
 0x18a   :  { %v2316_v9 = vpop.eup %2315  ;;  %v1175_v24 = vmul.f32 %v2314_v46, %v2831_v30  ;;  %v3269_v46 = vpop.permute.xlu2 %285 }
 0x18b   :  { %v2318_v42 = vpop.eup %2317  ;;  %1200 = vmatpush.msra.mxu0 %v1174_v6  ;;  %v1170_v11 = vmul.f32 %v2316_v9, %v2846_v35  ;;  %v276_v6 = vpop.permute.xlu1 %275 }
 0x18c   :  { %v2320_v47 = vpop.eup %2319  ;;  %1229 = vmatpush.msra.mxu1 %v1175_v24  ;;  %v1171_v40 = vmul.f32 %v2318_v42, %v2850_v36  ;;  %v3267_v26 = vpop.permute.xlu0 %260 }
 0x18d   :  { %v2322_v27 = vpop.eup %2321  ;;  %1201 = vmatpush.msra.mxu0 %v1172_v5  ;;  %v1168_v41 = vmul.f32 %v2320_v47, %v2857_v38 }
 0x18e   :  { %1230 = vmatpush.msra.mxu1 %v1173_v18  ;;  %2105 = vmatmul.msk.f32.gmra.mxu2 %vm68_vm1, %v198_v19  ;;  %v1169_v10 = vmul.f32 %v2322_v27, %v2860_v39 }
 0x18f   :  { %2154 = vmatmul.msk.f32.gmra.mxu3 %vm68_vm1, %v198_v19  ;;  %1202 = vmatpush.msra.mxu0 %v1170_v11 }
 0x190   :  { %1231 = vmatpush.msra.mxu1 %v1171_v40 }
 0x191   :  { %1203 = vmatpush.msra.mxu0 %v1168_v41 }
 0x192   :  { %1232 = vmatpush.msra.mxu1 %v1169_v10  ;;  %2180 = vmatmul.msk.f32.vlgmr.msra.gmra.mxu0 %vm973_vm2, %v1164_v12  ;;  %v3271_v24 = vpop.permute.xlu2 %325 }
 0x193   :  { %2184 = vmatmul.msk.f32.vlgmr.msra.gmra.mxu1 %vm973_vm2, %v1164_v12  ;;  %v271_v42 = vpop.permute.xlu1 %270 }
 0x194   :  { %v256_v9 = vpop.permute.xlu0 %255  ;;  %v669_v19 = vadd.f32 %v2958_v2, %v271_v42  ;;  %v830_v47 = vadd.f32 %v2960_v3, %v271_v42  ;;  %v672_v3 = vadd.f32 %v2975_v7, %v276_v6 }
 0x196   :  { %2106 = vmatmul.msk.f32.gmra.mxu2 %vm68_vm1, %v199_v15  ;;  %v1124_v27 = vadd.f32 %v3131_v16, %v669_v19  ;;  %v1125_v41 = vadd.f32 %v3133_v17, %v830_v47 }
 0x197   :  { %2155 = vmatmul.msk.f32.gmra.mxu3 %vm68_vm1, %v199_v15 }
 0x198   :  { %2323 = vtanh.f32 %v1124_v27 }
 0x199   :  { %2325 = vtanh.f32 %v1125_v41 }
 0x19a   :  { %2181 = vmatmul.msk.f32.gmra.mxu0 %vm973_vm2, %v1165_v45  ;;  %v3278_v40 = vpop.permute.xlu2 %320 }
 0x19b   :  { %2185 = vmatmul.msk.f32.gmra.mxu1 %vm973_vm2, %v1165_v45  ;;  %v311_v10 = vpop.permute.xlu1 %310 }
 0x19c   :  { %v251_v5 = vpop.permute.xlu0 %250  ;;  %v693_v45 = vadd.f32 %v3081_v51, %v311_v10  ;;  %v854_v2 = vadd.f32 %v3085_v53, %v311_v10  ;;  %v821_v51 = vadd.f32 %v2897_v49, %v256_v9  ;;  %v675_v49 = vadd.f32 %v2997_v13, %v281_v25 }
 0x19d   :  { %v657_v18 = vadd.f32 %v2877_v43, %v251_v5  ;;  %v818_v11 = vadd.f32 %v2879_v44, %v251_v5 }
 0x19e   :  { %v1119_v19 = vadd.f32 %v3094_v58, %v821_v51  ;;  %v1128_v13 = vadd.f32 %v3153_v34, %v675_v49  ;;  %v3762_v49 = vld [vmem:[#allocation7_spill] sm:$0xff] }
 0x19f   :  { %v1116_v12 = vadd.f32 %v3079_v50, %v657_v18  ;;  %v1117_v15 = vadd.f32 %v3083_v52, %v818_v11  ;;  %v660_v50 = vadd.f32 %v2894_v48, %v256_v9  ;;  %v1126_v52 = vadd.f32 %v3140_v21, %v672_v3 }
 0x1a0   :  { %v836_v18 = vadd.f32 %v2999_v14, %v281_v25 }
 0x1a1   :  { %2327 = vtanh.f32 %v1116_v12  ;;  %v1118_v7 = vadd.f32 %v3092_v57, %v660_v50 }
 0x1a2   :  { %2182 = vmatmul.msk.f32.gmra.mxu0 %vm973_vm2, %v1166_v31  ;;  %2329 = vtanh.f32 %v1117_v15  ;;  %v316_v5 = vpop.permute.xlu2 %315  ;;  %v824_v15 = vadd.f32 %v2918_v55, %v3267_v26  ;;  %v1129_v14 = vadd.f32 %v3155_v37, %v836_v18 }
 0x1a3   :  { %2186 = vmatmul.msk.f32.gmra.mxu1 %vm973_vm2, %v1166_v31  ;;  %v833_v31 = vadd.f32 %v2978_v8, %v276_v6  ;;  %v663_v6 = vadd.f32 %v2916_v54, %v3267_v26  ;;  %v696_v48 = vadd.f32 %v3096_v59, %v316_v5  ;;  %v3758_v26 = vld [vmem:[#allocation9_spill] sm:$0xff] }
 0x1a4   :  { %v1121_v34 = vadd.f32 %v3107_v1, %v824_v15  ;;  %v3760_v1 = vld [vmem:[#allocation6_spill] sm:$0xff] }
 0x1a5   :  { %v1127_v53 = vadd.f32 %v3144_v23, %v833_v31  ;;  %v857_v23 = vadd.f32 %v3098_v62, %v316_v5  ;;  %v839_v31 = vadd.f32 %v3758_v26, %v3269_v46 }
 0x1aa   :  { %2183 = vmatmul.msk.f32.gmra.mxu0 %vm973_vm2, %v1167_v61 }
 0x1ab   :  { %2187 = vmatmul.msk.f32.gmra.mxu1 %vm973_vm2, %v1167_v61  ;;  %v2324_v61 = vpop.eup %2323 }
 0x1ac   :  { %v2326_v42 = vpop.eup %2325  ;;  %v1262_v9 = vsub.f32 1.0, %v2324_v61 }
 0x1ad   :  { %v2328_v8 = vpop.eup %2327  ;;  %v1263_v58 = vsub.f32 1.0, %v2326_v42 }
 0x1ae   :  { %v2330_v21 = vpop.eup %2329  ;;  %v1278_v12 = vmul.f32 %v2328_v8, %v2857_v38 }
 0x1af   :  { %v1279_v10 = vmul.f32 %v2330_v21, %v2860_v39 }
 0x20f   :  { %v1205_v43 = vpop.f32.mrf.mxu0 }
 0x210   :  { %v1246_v44 = vadd.f32 %v1205_v43, %v693_v45  ;;  %v1234_v16 = vpop.f32.mrf.mxu1 }
 0x211   :  { %v1247_v17 = vadd.f32 %v1234_v16, %v854_v2  ;;  %v1120_v2 = vadd.f32 %v3105_v0, %v663_v6  ;;  %v3757_v16 = vld [vmem:[#allocation10_spill] sm:$0xff]  ;;  %v3761_v6 = vld [vmem:[#allocation20_spill] sm:$0xff] }
 0x212   :  { %2331 = vtanh.f32 %v1246_v44  ;;  %v3756_v44 = vld [vmem:[#allocation8_spill] sm:$0xff]  ;;  %v699_v55 = vadd.f32 %v3757_v16, %v3278_v40 }
 0x213   :  { %2333 = vtanh.f32 %v1247_v17  ;;  %v678_v39 = vadd.f32 %v3756_v44, %v3269_v46  ;;  %v3759_v17 = vld [vmem:[#allocation11_spill] sm:$0xff] }
 0x214   :  { %2335 = vtanh.f32 %v1126_v52  ;;  %v860_v0 = vadd.f32 %v3759_v17, %v3278_v40 }
 0x215   :  { %2337 = vtanh.f32 %v1127_v53  ;;  %v666_v53 = vadd.f32 %v3760_v1, %v3265_v20 }
 0x216   :  { %2339 = vtanh.f32 %v1118_v7 }
 0x217   :  { %v1208_v47 = vpop.f32.mrf.mxu0  ;;  %2341 = vtanh.f32 %v1119_v19 }
 0x218   :  { %v2332_v57 = vpop.eup %2331  ;;  %v1248_v27 = vadd.f32 %v1208_v47, %v696_v48  ;;  %v1237_v11 = vpop.f32.mrf.mxu1  ;;  %v1130_v48 = vadd.f32 %v3761_v6, %v678_v39  ;;  %v2194_v6 = vld [vmem:[%s3729_s5 + $0x90] sm:$0xff] }
 0x219   :  { %v2334_v41 = vpop.eup %2333  ;;  %v1249_v54 = vadd.f32 %v1237_v11, %v857_v23  ;;  %v1270_v59 = vmul.f32 %v2332_v57, %v1262_v9  ;;  %v827_v23 = vadd.f32 %v3762_v49, %v3265_v20  ;;  %v3763_v9 = vld [vmem:[#allocation21_spill] sm:$0xff]  ;;  %v3767_v20 = vld [vmem:[#allocation15_spill] sm:$0xff] }
 0x21a   :  { %2343 = vtanh.f32 %v1248_v27  ;;  %v1271_v62 = vmul.f32 %v2334_v41, %v1263_v58  ;;  %v2336_v45 = vpop.eup %2335  ;;  %v1131_v47 = vadd.f32 %v3763_v9, %v839_v31  ;;  %v3764_v58 = vld [vmem:[#allocation12_spill] sm:$0xff]  ;;  %v3765_v41 = vld [vmem:[#allocation13_spill] sm:$0xff]  ;;  %v2198_v49 = vld [vmem:[%s3729_s5 + $0xb0] sm:$0xff] }
 0x21b   :  { %2345 = vtanh.f32 %v1249_v54  ;;  %v3305_v25 = vadd.f32 %v1278_v12, %v1270_v59  ;;  %v2338_v38 = vpop.eup %2337  ;;  %v1264_v50 = vsub.f32 1.0, %v2336_v45  ;;  %v1122_v27 = vadd.f32 %v3764_v58, %v666_v53  ;;  %v3766_v12 = vld [vmem:[#allocation14_spill] sm:$0xff] }
 0x21c   :  { %v3308_v43 = vadd.f32 %v1279_v10, %v1271_v62  ;;  %v2340_v3 = vpop.eup %2339  ;;  %2347 = vtanh.f32 %v1128_v13  ;;  %v1265_v61 = vsub.f32 1.0, %v2338_v38  ;;  %v1123_v54 = vadd.f32 %v3765_v41, %v827_v23  ;;  %v2199_v23 = vld [vmem:[%s3729_s5 + $0xb8] sm:$0xff] }
 0x21d   :  { %v2342_v37 = vpop.eup %2341  ;;  %2349 = vtanh.f32 %v1129_v14  ;;  %v1280_v46 = vmul.f32 %v2340_v3, %v2846_v35  ;;  %v863_v62 = vadd.f32 %v3767_v20, %v3271_v24 }
 0x21e   :  { %2351 = vtanh.f32 %v1120_v2  ;;  %v1281_v21 = vmul.f32 %v2342_v37, %v2850_v36  ;;  %v702_v36 = vadd.f32 %v3766_v12, %v3271_v24 }
 0x21f   :  { %v1211_v52 = vpop.f32.mrf.mxu0  ;;  %2353 = vtanh.f32 %v1121_v34 }
 0x220   :  { %v2344_v51 = vpop.eup %2343  ;;  %v1250_v7 = vadd.f32 %v1211_v52, %v699_v55  ;;  %v1240_v42 = vpop.f32.mrf.mxu1 }
 0x221   :  { %v2346_v5 = vpop.eup %2345  ;;  %v1251_v19 = vadd.f32 %v1240_v42, %v860_v0  ;;  %v1272_v8 = vmul.f32 %v2344_v51, %v1264_v50 }
 0x222   :  { %2355 = vtanh.f32 %v1250_v7  ;;  %v1273_v40 = vmul.f32 %v2346_v5, %v1265_v61  ;;  %v2348_v18 = vpop.eup %2347  ;;  %v2190_v5 = vld [vmem:[%s3729_s5 + $0x70] sm:$0xff] }
 0x223   :  { %2357 = vtanh.f32 %v1251_v19  ;;  %v3327_v57 = vadd.f32 %v1280_v46, %v1272_v8  ;;  %v2350_v35 = vpop.eup %2349  ;;  %v1266_v10 = vsub.f32 1.0, %v2348_v18  ;;  %v2191_v19 = vld [vmem:[%s3729_s5 + $0x78] sm:$0xff]  ;;  %v2192_v8 = vld [vmem:[%s3729_s5 + $0x80] sm:$0xff]  ;;  %v2193_v46 = vld [vmem:[%s3729_s5 + $0x88] sm:$0xff] }
 0x224   :  { %v3330_v11 = vadd.f32 %v1281_v21, %v1273_v40  ;;  %v2352_v59 = vpop.eup %2351  ;;  %2359 = vtanh.f32 %v1130_v48  ;;  %v1267_v45 = vsub.f32 1.0, %v2350_v35  ;;  %v2195_v48 = vld [vmem:[%s3729_s5 + $0x98] sm:$0xff]  ;;  %v2196_v40 = vld [vmem:[%s3729_s5 + $0xa0] sm:$0xff]  ;;  %v2197_v21 = vld [vmem:[%s3729_s5 + $0xa8] sm:$0xff] }
 0x225   :  { %v2354_v13 = vpop.eup %2353  ;;  %2361 = vtanh.f32 %v1131_v47  ;;  %v1282_v39 = vmul.f32 %v2352_v59, %v2837_v32 }
 0x226   :  { %2363 = vtanh.f32 %v1122_v27  ;;  %v1283_v55 = vmul.f32 %v2354_v13, %v2840_v33 }
 0x227   :  { %v1214_v15 = vpop.f32.mrf.mxu0  ;;  %2365 = vtanh.f32 %v1123_v54 }
 0x228   :  { %v2356_v14 = vpop.eup %2355  ;;  %v1252_v2 = vadd.f32 %v1214_v15, %v702_v36  ;;  %v1243_v38 = vpop.f32.mrf.mxu1 }
 0x229   :  { %v2358_v34 = vpop.eup %2357  ;;  %v1253_v3 = vadd.f32 %v1243_v38, %v863_v62  ;;  %v1274_v44 = vmul.f32 %v2356_v14, %v1266_v10  ;;  %v728_v10 = vpop.f32.mrf.mxu2 }
 0x22a   :  { %2367 = vtanh.f32 %v1252_v2  ;;  %v1275_v16 = vmul.f32 %v2358_v34, %v1267_v45  ;;  %v2360_v37 = vpop.eup %2359  ;;  %v889_v15 = vpop.f32.mrf.mxu3 }
 0x22b   :  { %2369 = vtanh.f32 %v1253_v3  ;;  %v3339_v24 = vadd.f32 %v1282_v39, %v1274_v44  ;;  %v2362_v31 = vpop.eup %2361  ;;  %v1268_v50 = vsub.f32 1.0, %v2360_v37  ;;  %v386_v37 = vpop.permute.xlu2 %385 }
 0x22c   :  { %v3341_v26 = vadd.f32 %v1283_v55, %v1275_v16  ;;  %v2364_v17 = vpop.eup %2363  ;;  %v1269_v51 = vsub.f32 1.0, %v2362_v31 }
 0x22d   :  { %v2366_v0 = vpop.eup %2365  ;;  %v1284_v53 = vmul.f32 %v2364_v17, %v2829_v29  ;;  %v2188_v29 = vld [vmem:[%s3729_s5 + $0x60] sm:$0xff] }
 0x22e   :  { %v1285_v61 = vmul.f32 %v2366_v0, %v2831_v30  ;;  %v2189_v30 = vld [vmem:[%s3729_s5 + $0x68] sm:$0xff]  ;;  %v381_v0 = vpop.permute.xlu0 %380 }
 0x230   :  { %v2368_v52 = vpop.eup %2367 }
 0x231   :  { %v2370_v1 = vpop.eup %2369  ;;  %v1276_v32 = vmul.f32 %v2368_v52, %v1268_v50  ;;  %v731_v2 = vpop.f32.mrf.mxu2 }
 0x232   :  { %v1277_v7 = vmul.f32 %v2370_v1, %v1269_v51  ;;  %v892_v34 = vpop.f32.mrf.mxu3 }
 0x233   :  { %v3345_v33 = vadd.f32 %v1284_v53, %v1276_v32  ;;  %v376_v32 = vpop.permute.xlu1 %375 }
 0x234   :  { %v3347_v42 = vadd.f32 %v1285_v61, %v1277_v7  ;;  %v732_v7 = vadd.f32 %v731_v2, %v376_v32 }
 0x235   :  { %1355 = vmatpush.msrb.mxu0 %v3345_v33 }
 0x236   :  { %1408 = vmatpush.msrb.mxu1 %v3347_v42 }
 0x237   :  { %1356 = vmatpush.msrb.mxu0 %v3339_v24 }
 0x238   :  { %1409 = vmatpush.msrb.mxu1 %v3341_v26 }
 0x239   :  { %1357 = vmatpush.msrb.mxu0 %v3327_v57  ;;  %v734_v16 = vpop.f32.mrf.mxu2 }
 0x23a   :  { %1410 = vmatpush.msrb.mxu1 %v3330_v11  ;;  %v895_v55 = vpop.f32.mrf.mxu3  ;;  %v735_v50 = vadd.f32 %v734_v16, %v381_v0 }
 0x23b   :  { %1358 = vmatpush.msrb.mxu0 %v3305_v25  ;;  %v896_v52 = vadd.f32 %v895_v55, %v381_v0 }
 0x23c   :  { %1411 = vmatpush.msrb.mxu1 %v3308_v43  ;;  %2200 = vmatmul.msk.f32.vlgmr.msrb.gmra.mxu0 %vm973_vm2, %v2188_v29 }
 0x23d   :  { %2212 = vmatmul.msk.f32.vlgmr.msrb.gmra.mxu1 %vm973_vm2, %v2188_v29 }
 0x241   :  { %v737_v51 = vpop.f32.mrf.mxu2 }
 0x242   :  { %v898_v1 = vpop.f32.mrf.mxu3  ;;  %v738_v29 = vadd.f32 %v737_v51, %v386_v37 }
 0x244   :  { %2201 = vmatmul.msk.f32.gmra.mxu0 %vm973_vm2, %v2189_v30 }
 0x245   :  { %2213 = vmatmul.msk.f32.gmra.mxu1 %vm973_vm2, %v2189_v30  ;;  %v371_v30 = vpop.permute.xlu2 %370 }
 0x24c   :  { %2202 = vmatmul.msk.f32.gmra.mxu0 %vm973_vm2, %v2190_v5 }
 0x24d   :  { %2214 = vmatmul.msk.f32.gmra.mxu1 %vm973_vm2, %v2190_v5  ;;  %v893_v5 = vadd.f32 %v892_v34, %v376_v32  ;;  %v2225_v32 = vld [vmem:[%s3730_s6 + $0x28] sm:$0xff] }
 0x254   :  { %2203 = vmatmul.msk.f32.gmra.mxu0 %vm973_vm2, %v2191_v19 }
 0x255   :  { %2215 = vmatmul.msk.f32.gmra.mxu1 %vm973_vm2, %v2191_v19  ;;  %v899_v19 = vadd.f32 %v898_v1, %v386_v37  ;;  %v2224_v1 = vld [vmem:[%s3730_s6 + $0x20] sm:$0xff] }
 0x25c   :  { %2204 = vmatmul.msk.f32.gmra.mxu0 %vm973_vm2, %v2192_v8 }
 0x25d   :  { %2216 = vmatmul.msk.f32.gmra.mxu1 %vm973_vm2, %v2192_v8 }
 0x264   :  { %2205 = vmatmul.msk.f32.gmra.mxu0 %vm973_vm2, %v2193_v46 }
 0x265   :  { %2217 = vmatmul.msk.f32.gmra.mxu1 %vm973_vm2, %v2193_v46  ;;  %v729_v46 = vadd.f32 %v728_v10, %v371_v30 }
 0x26c   :  { %2206 = vmatmul.msk.f32.gmra.mxu0 %vm973_vm2, %v2194_v6 }
 0x26d   :  { %2218 = vmatmul.msk.f32.gmra.mxu1 %vm973_vm2, %v2194_v6 }
 0x274   :  { %2207 = vmatmul.msk.f32.gmra.mxu0 %vm973_vm2, %v2195_v48 }
 0x275   :  { %2219 = vmatmul.msk.f32.gmra.mxu1 %vm973_vm2, %v2195_v48 }
 0x27c   :  { %2208 = vmatmul.msk.f32.gmra.mxu0 %vm973_vm2, %v2196_v40 }
 0x27d   :  { %2220 = vmatmul.msk.f32.gmra.mxu1 %vm973_vm2, %v2196_v40 }
 0x284   :  { %2209 = vmatmul.msk.f32.gmra.mxu0 %vm973_vm2, %v2197_v21 }
 0x285   :  { %2221 = vmatmul.msk.f32.gmra.mxu1 %vm973_vm2, %v2197_v21  ;;  %v890_v21 = vadd.f32 %v889_v15, %v371_v30  ;;  %v361_v30 = vpop.permute.xlu2 %360 }
 0x28c   :  { %2210 = vmatmul.msk.f32.gmra.mxu0 %vm973_vm2, %v2198_v49 }
 0x28d   :  { %2222 = vmatmul.msk.f32.gmra.mxu1 %vm973_vm2, %v2198_v49 }
 0x294   :  { %2211 = vmatmul.msk.f32.gmra.mxu0 %vm973_vm2, %v2199_v23 }
 0x295   :  { %2223 = vmatmul.msk.f32.gmra.mxu1 %vm973_vm2, %v2199_v23 }
 0x2b9   :  { %v3417_v9 = vpop.f32.mrf.mxu0 }
 0x2ba   :  { %v3419_v47 = vpop.f32.mrf.mxu1 }
 0x2c1   :  { %v3421_v18 = vpop.f32.mrf.mxu0 }
 0x2c2   :  { %v3423_v58 = vpop.f32.mrf.mxu1 }
 0x2c9   :  { %v3425_v27 = vpop.f32.mrf.mxu0 }
 0x2ca   :  { %v3427_v35 = vpop.f32.mrf.mxu1 }
 0x2d1   :  { %v3429_v41 = vpop.f32.mrf.mxu0 }
 0x2d2   :  { %v3431_v54 = vpop.f32.mrf.mxu1 }
 0x2d9   :  { %v3433_v59 = vpop.f32.mrf.mxu0 }
 0x2da   :  { %v3435_v12 = vpop.f32.mrf.mxu1 }
 0x2e1   :  { %v3437_v36 = vpop.f32.mrf.mxu0 }
 0x2e2   :  { %v3439_v13 = vpop.f32.mrf.mxu1 }
 0x2e9   :  { %v3441_v20 = vpop.f32.mrf.mxu0 }
 0x2ea   :  { %v3443_v62 = vpop.f32.mrf.mxu1 }
 0x2f1   :  { %v3445_v14 = vpop.f32.mrf.mxu0 }
 0x2f2   :  { %v3447_v45 = vpop.f32.mrf.mxu1 }
 0x2f9   :  { %v1384_v38 = vpop.f32.mrf.mxu0 }
 0x2fa   :  { %v1437_v3 = vpop.f32.mrf.mxu1  ;;  %v1465_v16 = vadd.f32 %v1384_v38, %v729_v46 }
 0x2fb   :  { %v1466_v55 = vadd.f32 %v1437_v3, %v890_v21  ;;  %v901_v21 = vpop.f32.mrf.mxu3 }
 0x301   :  { %v1387_v44 = vpop.f32.mrf.mxu0 }
 0x302   :  { %v1440_v39 = vpop.f32.mrf.mxu1  ;;  %v1467_v6 = vadd.f32 %v1387_v44, %v732_v7  ;;  %v2227_v7 = vld [vmem:[%s3730_s6 + $0x38] sm:$0xff] }
 0x303   :  { %v1468_v49 = vadd.f32 %v1440_v39, %v893_v5 }
 0x309   :  { %v1390_v31 = vpop.f32.mrf.mxu0 }
 0x30a   :  { %v1443_v17 = vpop.f32.mrf.mxu1  ;;  %v1469_v53 = vadd.f32 %v1390_v31, %v735_v50 }
 0x30b   :  { %v1470_v61 = vadd.f32 %v1443_v17, %v896_v52 }
 0x30c   :  { %2371 = vtanh.f32 %v1469_v53 }
 0x30d   :  { %2373 = vtanh.f32 %v1470_v61  ;;  %v2226_v61 = vld [vmem:[%s3730_s6 + $0x30] sm:$0xff] }
 0x311   :  { %v1393_v8 = vpop.f32.mrf.mxu0 }
 0x312   :  { %v1471_v48 = vadd.f32 %v1393_v8, %v738_v29  ;;  %v1446_v40 = vpop.f32.mrf.mxu1  ;;  %v2372_v2 = vpop.eup %2371 }
 0x313   :  { %v1472_v23 = vadd.f32 %v1446_v40, %v899_v19  ;;  %v2374_v34 = vpop.eup %2373  ;;  %v1506_v38 = vmul.f32 %v2372_v2, %v3339_v24  ;;  %v3477_v29 = vpop.permute.xlu1 %345 }
 0x314   :  { %2375 = vtanh.f32 %v1471_v48  ;;  %v1507_v3 = vmul.f32 %v2374_v34, %v3341_v26  ;;  %v3481_v19 = vpop.permute.xlu0 %365  ;;  %v356_v8 = vpop.permute.xlu2 %355  ;;  %v3770_v34 = vld [vmem:[#allocation16_spill] sm:$0xff] }
 0x315   :  { %2377 = vtanh.f32 %v1472_v23  ;;  %v740_v40 = vpop.f32.mrf.mxu2 }
 0x316   :  { %2379 = vtanh.f32 %v1467_v6 }
 0x317   :  { %2381 = vtanh.f32 %v1468_v49  ;;  %v3768_v49 = vld [vmem:[#allocation26_spill] sm:$0xff] }
 0x318   :  { %2383 = vtanh.f32 %v1465_v16 }
 0x319   :  { %2385 = vtanh.f32 %v1466_v55  ;;  %v3769_v55 = vld [vmem:[#allocation27_spill] sm:$0xff] }
 0x31a   :  { %v2376_v37 = vpop.eup %2375 }
 0x31b   :  { %v2378_v10 = vpop.eup %2377  ;;  %v1508_v44 = vmul.f32 %v2376_v37, %v3345_v33  ;;  %v3479_v5 = vpop.permute.xlu1 %340 }
 0x31c   :  { %v2380_v31 = vpop.eup %2379  ;;  %v1509_v15 = vmul.f32 %v2378_v10, %v3347_v42  ;;  %v3483_v6 = vpop.permute.xlu0 %405 }
 0x31d   :  { %v2382_v39 = vpop.eup %2381  ;;  %1534 = vmatpush.msra.mxu0 %v1508_v44  ;;  %v1504_v50 = vmul.f32 %v2380_v31, %v3327_v57  ;;  %v351_v48 = vpop.permute.xlu2 %350  ;;  %v3771_v31 = vld [vmem:[#allocation17_spill] sm:$0xff] }
 0x31e   :  { %v2384_v17 = vpop.eup %2383  ;;  %1563 = vmatpush.msra.mxu1 %v1509_v15  ;;  %v1505_v52 = vmul.f32 %v2382_v39, %v3330_v11  ;;  %v717_v23 = vadd.f32 %v3768_v49, %v351_v48  ;;  %v878_v2 = vadd.f32 %v3769_v55, %v351_v48  ;;  %v3773_v48 = vld [vmem:[#allocation19_spill] sm:$0xff] }
 0x31f   :  { %v2386_v0 = vpop.eup %2385  ;;  %1535 = vmatpush.msra.mxu0 %v1506_v38  ;;  %v1502_v51 = vmul.f32 %v2384_v17, %v3305_v25 }
 0x320   :  { %1564 = vmatpush.msra.mxu1 %v1507_v3  ;;  %v1503_v53 = vmul.f32 %v2386_v0, %v3308_v43  ;;  %v1457_v10 = vadd.f32 %v3433_v59, %v717_v23  ;;  %v1458_v39 = vadd.f32 %v3435_v12, %v878_v2  ;;  %v904_v59 = vpop.f32.mrf.mxu3 }
 0x321   :  { %1536 = vmatpush.msra.mxu0 %v1504_v50 }
 0x322   :  { %1565 = vmatpush.msra.mxu1 %v1505_v52  ;;  %2387 = vtanh.f32 %v1457_v10  ;;  %v743_v52 = vpop.f32.mrf.mxu2 }
 0x323   :  { %1537 = vmatpush.msra.mxu0 %v1502_v51  ;;  %v336_v46 = vpop.permute.xlu1 %335  ;;  %2389 = vtanh.f32 %v1458_v39 }
 0x324   :  { %1566 = vmatpush.msra.mxu1 %v1503_v53  ;;  %2228 = vmatmul.msk.f32.vlgmr.msra.gmra.mxu0 %vm973_vm2, %v2224_v1  ;;  %v3489_v44 = vpop.permute.xlu0 %400 }
 0x325   :  { %2232 = vmatmul.msk.f32.vlgmr.msra.gmra.mxu1 %vm973_vm2, %v2224_v1  ;;  %v391_v17 = vpop.permute.xlu2 %390  ;;  %v720_v1 = vadd.f32 %v3210_v4, %v356_v8 }
 0x326   :  { %v741_v0 = vadd.f32 %v740_v40, %v391_v17  ;;  %v902_v50 = vadd.f32 %v901_v21, %v391_v17  ;;  %v869_v40 = vadd.f32 %v3773_v48, %v336_v46 }
 0x328   :  { %v2388_v49 = vpop.eup %2387  ;;  %v1452_v55 = vadd.f32 %v3423_v58, %v869_v40 }
 0x329   :  { %v2390_v23 = vpop.eup %2389  ;;  %v1596_v10 = vsub.f32 1.0, %v2388_v49 }
 0x32a   :  { %v746_v17 = vpop.f32.mrf.mxu2 }
 0x32b   :  { %v331_v16 = vpop.permute.xlu1 %330 }
 0x32c   :  { %2229 = vmatmul.msk.f32.gmra.mxu0 %vm973_vm2, %v2225_v32  ;;  %v705_v37 = vadd.f32 %v3770_v34, %v331_v16  ;;  %v866_v15 = vadd.f32 %v3771_v31, %v331_v16  ;;  %v396_v16 = vpop.permute.xlu0 %395 }
 0x32d   :  { %2233 = vmatmul.msk.f32.gmra.mxu1 %vm973_vm2, %v2225_v32  ;;  %v744_v34 = vadd.f32 %v743_v52, %v396_v16  ;;  %v907_v52 = vpop.f32.mrf.mxu3 }
 0x32e   :  { %v1449_v38 = vadd.f32 %v3417_v9, %v705_v37  ;;  %v1450_v3 = vadd.f32 %v3419_v47, %v866_v15  ;;  %v3772_v9 = vld [vmem:[#allocation18_spill] sm:$0xff]  ;;  %v1459_v47 = vadd.f32 %v3437_v36, %v720_v1  ;;  %v723_v37 = vadd.f32 %v3225_v63, %v361_v30 }
 0x32f   :  { %v1597_v15 = vsub.f32 1.0, %v2390_v23  ;;  %v908_v48 = vadd.f32 %v907_v52, %v3489_v44 }
 0x330   :  { %2391 = vtanh.f32 %v1449_v38  ;;  %v1461_v63 = vadd.f32 %v3441_v20, %v723_v37 }
 0x331   :  { %2393 = vtanh.f32 %v1450_v3 }
 0x334   :  { %2230 = vmatmul.msk.f32.gmra.mxu0 %vm973_vm2, %v2226_v61 }
 0x335   :  { %2234 = vmatmul.msk.f32.gmra.mxu1 %vm973_vm2, %v2226_v61  ;;  %v881_v61 = vadd.f32 %v3212_v60, %v356_v8  ;;  %v3774_v8 = vld [vmem:[#allocation22_spill] sm:$0xff] }
 0x336   :  { %v2392_v60 = vpop.eup %2391  ;;  %v711_v2 = vadd.f32 %v3774_v8, %v3479_v5 }
 0x337   :  { %v1460_v21 = vadd.f32 %v3439_v13, %v881_v61  ;;  %v2394_v36 = vpop.eup %2393 }
 0x338   :  { %v1613_v1 = vmul.f32 %v2394_v36, %v3308_v43  ;;  %v1453_v61 = vadd.f32 %v3425_v27, %v711_v2 }
 0x33c   :  { %2231 = vmatmul.msk.f32.gmra.mxu0 %vm973_vm2, %v2227_v7 }
 0x33d   :  { %2235 = vmatmul.msk.f32.gmra.mxu1 %vm973_vm2, %v2227_v7  ;;  %v708_v7 = vadd.f32 %v3772_v9, %v336_v46  ;;  %v905_v46 = vadd.f32 %v904_v59, %v396_v16 }
 0x33f   :  { %v1451_v4 = vadd.f32 %v3421_v18, %v708_v7  ;;  %v884_v18 = vadd.f32 %v3228_v56, %v361_v30  ;;  %v3775_v56 = vld [vmem:[#allocation23_spill] sm:$0xff]  ;;  %v3776_v7 = vld [vmem:[#allocation24_spill] sm:$0xff] }
 0x340   :  { %v872_v30 = vadd.f32 %v3775_v56, %v3479_v5  ;;  %v714_v43 = vadd.f32 %v3776_v7, %v3477_v29 }
 0x341   :  { %v1462_v59 = vadd.f32 %v3443_v62, %v884_v18  ;;  %v726_v62 = vadd.f32 %v3244_v28, %v3481_v19 }
 0x342   :  { %v1454_v20 = vadd.f32 %v3427_v35, %v872_v30  ;;  %v887_v35 = vadd.f32 %v3247_v22, %v3481_v19  ;;  %v749_v22 = vpop.f32.mrf.mxu2 }
 0x343   :  { %v1463_v28 = vadd.f32 %v3445_v14, %v726_v62  ;;  %v2239_v62 = vld [vmem:[%s3729_s5 + $0xd8] sm:$0xff] }
 0x344   :  { %v1464_v19 = vadd.f32 %v3447_v45, %v887_v35  ;;  %v2244_v35 = vld [vmem:[%s3729_s5 + $0x100] sm:$0xff] }
 0x3a1   :  { %v1539_v51 = vpop.f32.mrf.mxu0 }
 0x3a2   :  { %v1580_v53 = vadd.f32 %v1539_v51, %v741_v0  ;;  %v1568_v32 = vpop.f32.mrf.mxu1 }
 0x3a3   :  { %v1581_v12 = vadd.f32 %v1568_v32, %v902_v50  ;;  %v1612_v50 = vmul.f32 %v2392_v60, %v3305_v25 }
 0x3a4   :  { %2395 = vtanh.f32 %v1580_v53 }
 0x3a5   :  { %2397 = vtanh.f32 %v1581_v12 }
 0x3a6   :  { %2399 = vtanh.f32 %v1459_v47  ;;  %v747_v47 = vadd.f32 %v746_v17, %v3489_v44 }
 0x3a7   :  { %2401 = vtanh.f32 %v1460_v21 }
 0x3a8   :  { %2403 = vtanh.f32 %v1451_v4 }
 0x3a9   :  { %v1542_v13 = vpop.f32.mrf.mxu0  ;;  %2405 = vtanh.f32 %v1452_v55 }
 0x3aa   :  { %v2396_v31 = vpop.eup %2395  ;;  %v1582_v39 = vadd.f32 %v1542_v13, %v744_v34  ;;  %v1571_v58 = vpop.f32.mrf.mxu1  ;;  %v3777_v34 = vld [vmem:[#allocation25_spill] sm:$0xff]  ;;  %v1455_v13 = vadd.f32 %v3429_v41, %v714_v43 }
 0x3ab   :  { %v2398_v38 = vpop.eup %2397  ;;  %v1583_v3 = vadd.f32 %v1571_v58, %v905_v46  ;;  %v1604_v0 = vmul.f32 %v2396_v31, %v1596_v10  ;;  %v875_v36 = vadd.f32 %v3777_v34, %v3477_v29  ;;  %v910_v10 = vpop.f32.mrf.mxu3 }
 0x3ac   :  { %2407 = vtanh.f32 %v1582_v39  ;;  %v1605_v51 = vmul.f32 %v2398_v38, %v1597_v15  ;;  %v2400_v32 = vpop.eup %2399  ;;  %v911_v15 = vadd.f32 %v910_v10, %v3483_v6 }
 0x3ad   :  { %2409 = vtanh.f32 %v1583_v3  ;;  %v3513_v53 = vadd.f32 %v1612_v50, %v1604_v0  ;;  %v2402_v25 = vpop.eup %2401  ;;  %v1598_v40 = vsub.f32 1.0, %v2400_v32  ;;  %v1456_v31 = vadd.f32 %v3431_v54, %v875_v36  ;;  %v3625_v36 = vpop.permute.xlu2 %455 }
 0x3ae   :  { %v3516_v12 = vadd.f32 %v1613_v1, %v1605_v51  ;;  %v2404_v9 = vpop.eup %2403  ;;  %2411 = vtanh.f32 %v1461_v63  ;;  %v1599_v49 = vsub.f32 1.0, %v2402_v25 }
 0x3af   :  { %v2406_v5 = vpop.eup %2405  ;;  %2413 = vtanh.f32 %v1462_v59  ;;  %v1614_v8 = vmul.f32 %v2404_v9, %v3327_v57 }
 0x3b0   :  { %2415 = vtanh.f32 %v1453_v61  ;;  %v1615_v2 = vmul.f32 %v2406_v5, %v3330_v11  ;;  %v750_v11 = vadd.f32 %v749_v22, %v3483_v6  ;;  %v2238_v5 = vld [vmem:[%s3729_s5 + $0xd0] sm:$0xff] }
 0x3b1   :  { %v1545_v27 = vpop.f32.mrf.mxu0  ;;  %2417 = vtanh.f32 %v1454_v20 }
 0x3b2   :  { %v2408_v21 = vpop.eup %2407  ;;  %v1584_v4 = vadd.f32 %v1545_v27, %v747_v47  ;;  %v1574_v23 = vpop.f32.mrf.mxu1  ;;  %v2242_v27 = vld [vmem:[%s3729_s5 + $0xf0] sm:$0xff] }
 0x3b3   :  { %v2410_v16 = vpop.eup %2409  ;;  %v1585_v55 = vadd.f32 %v1574_v23, %v908_v48  ;;  %v1606_v60 = vmul.f32 %v2408_v21, %v1598_v40  ;;  %v2240_v48 = vld [vmem:[%s3729_s5 + $0xe0] sm:$0xff]  ;;  %v2241_v40 = vld [vmem:[%s3729_s5 + $0xe8] sm:$0xff]  ;;  %v2243_v21 = vld [vmem:[%s3729_s5 + $0xf8] sm:$0xff] }
 0x3b4   :  { %2419 = vtanh.f32 %v1584_v4  ;;  %v1607_v44 = vmul.f32 %v2410_v16, %v1599_v49  ;;  %v2412_v46 = vpop.eup %2411  ;;  %v2245_v49 = vld [vmem:[%s3729_s5 + $0x108] sm:$0xff]  ;;  %v2246_v4 = vld [vmem:[%s3729_s5 + $0x110] sm:$0xff]  ;;  %v2247_v23 = vld [vmem:[%s3729_s5 + $0x118] sm:$0xff]  ;;  %v752_v16 = vpop.f32.mrf.mxu2 }
 0x3b5   :  { %2421 = vtanh.f32 %v1585_v55  ;;  %v3533_v37 = vadd.f32 %v1614_v8, %v1606_v60  ;;  %v2414_v14 = vpop.eup %2413  ;;  %v1600_v45 = vsub.f32 1.0, %v2412_v46  ;;  %v913_v55 = vpop.f32.mrf.mxu3 }
 0x3b6   :  { %v3536_v57 = vadd.f32 %v1615_v2, %v1607_v44  ;;  %v2416_v18 = vpop.eup %2415  ;;  %2423 = vtanh.f32 %v1463_v28  ;;  %v1601_v38 = vsub.f32 1.0, %v2414_v14  ;;  %v3621_v28 = vpop.permute.xlu1 %460 }
 0x3b7   :  { %v2418_v29 = vpop.eup %2417  ;;  %2425 = vtanh.f32 %v1464_v19  ;;  %v1616_v54 = vmul.f32 %v2416_v18, %v3339_v24  ;;  %v3623_v44 = vpop.permute.xlu0 %465 }
 0x3b8   :  { %2427 = vtanh.f32 %v1455_v13  ;;  %v1617_v63 = vmul.f32 %v2418_v29, %v3341_v26 }
 0x3b9   :  { %v1548_v39 = vpop.f32.mrf.mxu0  ;;  %2429 = vtanh.f32 %v1456_v31 }
 0x3ba   :  { %v2420_v58 = vpop.eup %2419  ;;  %v1586_v17 = vadd.f32 %v1548_v39, %v750_v11  ;;  %v1577_v41 = vpop.f32.mrf.mxu1 }
 0x3bb   :  { %v2422_v3 = vpop.eup %2421  ;;  %v1587_v0 = vadd.f32 %v1577_v41, %v911_v15  ;;  %v1608_v50 = vmul.f32 %v2420_v58, %v1600_v45  ;;  %v416_v15 = vpop.permute.xlu2 %415 }
 0x3bc   :  { %2431 = vtanh.f32 %v1586_v17  ;;  %v1609_v52 = vmul.f32 %v2422_v3, %v1601_v38  ;;  %v2424_v51 = vpop.eup %2423  ;;  %v755_v60 = vpop.f32.mrf.mxu2 }
 0x3bd   :  { %2433 = vtanh.f32 %v1587_v0  ;;  %v3543_v6 = vadd.f32 %v1616_v54, %v1608_v50  ;;  %v2426_v56 = vpop.eup %2425  ;;  %v1602_v32 = vsub.f32 1.0, %v2424_v51  ;;  %v916_v8 = vpop.f32.mrf.mxu3  ;;  %v756_v45 = vadd.f32 %v755_v60, %v416_v15 }
 0x3be   :  { %v3545_v1 = vadd.f32 %v1617_v63, %v1609_v52  ;;  %v2428_v30 = vpop.eup %2427  ;;  %v1603_v25 = vsub.f32 1.0, %v2426_v56  ;;  %v411_v22 = vpop.permute.xlu1 %410  ;;  %v917_v39 = vadd.f32 %v916_v8, %v416_v15 }
 0x3bf   :  { %v2430_v59 = vpop.eup %2429  ;;  %v1618_v9 = vmul.f32 %v2428_v30, %v3345_v33  ;;  %v2236_v33 = vld [vmem:[%s3729_s5 + $0xc0] sm:$0xff]  ;;  %v753_v19 = vadd.f32 %v752_v16, %v411_v22  ;;  %v914_v46 = vadd.f32 %v913_v55, %v411_v22  ;;  %v3631_v18 = vpop.permute.xlu0 %450 }
 0x3c0   :  { %v1619_v7 = vmul.f32 %v2430_v59, %v3347_v42  ;;  %v2237_v42 = vld [vmem:[%s3729_s5 + $0xc8] sm:$0xff] }
 0x3c2   :  { %v2432_v61 = vpop.eup %2431 }
 0x3c3   :  { %v2434_v20 = vpop.eup %2433  ;;  %v1610_v24 = vmul.f32 %v2432_v61, %v1602_v32 }
 0x3c4   :  { %v1611_v43 = vmul.f32 %v2434_v20, %v1603_v25  ;;  %v758_v2 = vpop.f32.mrf.mxu2 }
 0x3c5   :  { %v3549_v26 = vadd.f32 %v1618_v9, %v1610_v24  ;;  %v919_v34 = vpop.f32.mrf.mxu3 }
 0x3c6   :  { %v3551_v47 = vadd.f32 %v1619_v7, %v1611_v43  ;;  %v426_v59 = vpop.permute.xlu1 %425 }
 0x3c7   :  { %1689 = vmatpush.msrb.mxu0 %v3549_v26  ;;  %v421_v3 = vpop.permute.xlu0 %420 }
 0x3c8   :  { %1742 = vmatpush.msrb.mxu1 %v3551_v47  ;;  %v759_v50 = vadd.f32 %v758_v2, %v421_v3  ;;  %v920_v52 = vadd.f32 %v919_v34, %v421_v3 }
 0x3c9   :  { %1690 = vmatpush.msrb.mxu0 %v3543_v6 }
 0x3ca   :  { %1743 = vmatpush.msrb.mxu1 %v3545_v1 }
 0x3cb   :  { %1691 = vmatpush.msrb.mxu0 %v3533_v37 }
 0x3cc   :  { %1744 = vmatpush.msrb.mxu1 %v3536_v57  ;;  %v761_v11 = vpop.f32.mrf.mxu2 }
 0x3cd   :  { %1692 = vmatpush.msrb.mxu0 %v3513_v53  ;;  %v922_v29 = vpop.f32.mrf.mxu3  ;;  %v762_v32 = vadd.f32 %v761_v11, %v426_v59 }
 0x3ce   :  { %1745 = vmatpush.msrb.mxu1 %v3516_v12  ;;  %2248 = vmatmul.msk.f32.vlgmr.msrb.gmra.mxu0 %vm973_vm2, %v2236_v33  ;;  %v923_v61 = vadd.f32 %v922_v29, %v426_v59  ;;  %v441_v2 = vpop.permute.xlu1 %440 }
 0x3cf   :  { %2260 = vmatmul.msk.f32.vlgmr.msrb.gmra.mxu1 %vm973_vm2, %v2236_v33  ;;  %v431_v33 = vpop.permute.xlu2 %430 }
 0x3d4   :  { %v764_v0 = vpop.f32.mrf.mxu2 }
 0x3d5   :  { %v925_v54 = vpop.f32.mrf.mxu3 }
 0x3d6   :  { %2249 = vmatmul.msk.f32.gmra.mxu0 %vm973_vm2, %v2237_v42  ;;  %v446_v15 = vpop.permute.xlu1 %445 }
 0x3d7   :  { %2261 = vmatmul.msk.f32.gmra.mxu1 %vm973_vm2, %v2237_v42  ;;  %v765_v42 = vadd.f32 %v764_v0, %v431_v33 }
 0x3dc   :  { %v767_v25 = vpop.f32.mrf.mxu2 }
 0x3dd   :  { %v928_v9 = vpop.f32.mrf.mxu3 }
 0x3de   :  { %2250 = vmatmul.msk.f32.gmra.mxu0 %vm973_vm2, %v2238_v5 }
 0x3df   :  { %2262 = vmatmul.msk.f32.gmra.mxu1 %vm973_vm2, %v2238_v5  ;;  %v926_v5 = vadd.f32 %v925_v54, %v431_v33 }
 0x3e6   :  { %2251 = vmatmul.msk.f32.gmra.mxu0 %vm973_vm2, %v2239_v62 }
 0x3e7   :  { %2263 = vmatmul.msk.f32.gmra.mxu1 %vm973_vm2, %v2239_v62 }
 0x3ee   :  { %2252 = vmatmul.msk.f32.gmra.mxu0 %vm973_vm2, %v2240_v48 }
 0x3ef   :  { %2264 = vmatmul.msk.f32.gmra.mxu1 %vm973_vm2, %v2240_v48 }
 0x3f6   :  { %2253 = vmatmul.msk.f32.gmra.mxu0 %vm973_vm2, %v2241_v40 }
 0x3f7   :  { %2265 = vmatmul.msk.f32.gmra.mxu1 %vm973_vm2, %v2241_v40 }
 0x3fe   :  { %2254 = vmatmul.msk.f32.gmra.mxu0 %vm973_vm2, %v2242_v27 }
 0x3ff   :  { %2266 = vmatmul.msk.f32.gmra.mxu1 %vm973_vm2, %v2242_v27  ;;  %v770_v27 = vpop.f32.mrf.mxu2 }
 0x406   :  { %2255 = vmatmul.msk.f32.gmra.mxu0 %vm973_vm2, %v2243_v21 }
 0x407   :  { %2267 = vmatmul.msk.f32.gmra.mxu1 %vm973_vm2, %v2243_v21  ;;  %v773_v34 = vpop.f32.mrf.mxu2 }
 0x40e   :  { %2256 = vmatmul.msk.f32.gmra.mxu0 %vm973_vm2, %v2244_v35 }
 0x40f   :  { %2268 = vmatmul.msk.f32.gmra.mxu1 %vm973_vm2, %v2244_v35  ;;  %v931_v35 = vpop.f32.mrf.mxu3 }
 0x416   :  { %2257 = vmatmul.msk.f32.gmra.mxu0 %vm973_vm2, %v2245_v49 }
 0x417   :  { %2269 = vmatmul.msk.f32.gmra.mxu1 %vm973_vm2, %v2245_v49  ;;  %v436_v49 = vpop.permute.xlu0 %435  ;;  %v934_v22 = vpop.f32.mrf.mxu3 }
 0x41e   :  { %2258 = vmatmul.msk.f32.gmra.mxu0 %vm973_vm2, %v2246_v4 }
 0x41f   :  { %2270 = vmatmul.msk.f32.gmra.mxu1 %vm973_vm2, %v2246_v4  ;;  %v768_v4 = vadd.f32 %v767_v25, %v436_v49 }
 0x426   :  { %2259 = vmatmul.msk.f32.gmra.mxu0 %vm973_vm2, %v2247_v23 }
 0x427   :  { %2271 = vmatmul.msk.f32.gmra.mxu1 %vm973_vm2, %v2247_v23  ;;  %v929_v23 = vadd.f32 %v928_v9, %v436_v49 }
 0x44b   :  { %v1694_v10 = vpop.f32.mrf.mxu0 }
 0x44c   :  { %v3627_v13 = vadd.f32 %v1694_v10, %v753_v19  ;;  %v1747_v14 = vpop.f32.mrf.mxu1  ;;  %v771_v19 = vadd.f32 %v770_v27, %v441_v2 }
 0x44d   :  { %v3629_v31 = vadd.f32 %v1747_v14, %v914_v46  ;;  %v932_v46 = vadd.f32 %v931_v35, %v441_v2 }
 0x453   :  { %v1697_v58 = vpop.f32.mrf.mxu0 }
 0x454   :  { %v3633_v38 = vadd.f32 %v1697_v58, %v756_v45  ;;  %v1750_v17 = vpop.f32.mrf.mxu1  ;;  %v776_v45 = vpop.f32.mrf.mxu2 }
 0x455   :  { %v3635_v41 = vadd.f32 %v1750_v17, %v917_v39  ;;  %v774_v39 = vadd.f32 %v773_v34, %v446_v15  ;;  %v937_v58 = vpop.f32.mrf.mxu3  ;;  %v935_v17 = vadd.f32 %v934_v22, %v446_v15 }
 0x45b   :  { %v1700_v63 = vpop.f32.mrf.mxu0 }
 0x45c   :  { %v3637_v51 = vadd.f32 %v1700_v63, %v759_v50  ;;  %v1753_v56 = vpop.f32.mrf.mxu1 }
 0x45d   :  { %v3639_v30 = vadd.f32 %v1753_v56, %v920_v52  ;;  %v779_v52 = vpop.f32.mrf.mxu2  ;;  %v940_v56 = vpop.f32.mrf.mxu3 }
 0x45e   :  { %v780_v35 = vadd.f32 %v779_v52, %v3625_v36 }
 0x463   :  { %v1703_v20 = vpop.f32.mrf.mxu0 }
 0x464   :  { %v3641_v24 = vadd.f32 %v1703_v20, %v762_v32  ;;  %v1756_v7 = vpop.f32.mrf.mxu1 }
 0x465   :  { %v3643_v43 = vadd.f32 %v1756_v7, %v923_v61  ;;  %v782_v25 = vpop.f32.mrf.mxu2  ;;  %v943_v20 = vpop.f32.mrf.mxu3 }
 0x466   :  { %v783_v33 = vadd.f32 %v782_v25, %v3621_v28 }
 0x46b   :  { %v1706_v62 = vpop.f32.mrf.mxu0 }
 0x46c   :  { %v3645_v48 = vadd.f32 %v1706_v62, %v765_v42  ;;  %v1759_v40 = vpop.f32.mrf.mxu1  ;;  %v944_v42 = vadd.f32 %v943_v20, %v3621_v28  ;;  %v938_v28 = vadd.f32 %v937_v58, %v3631_v18  ;;  %v2273_v20 = vld [vmem:[%s3730_s6 + $0x48] sm:$0xff] }
 0x46d   :  { %v3647_v21 = vadd.f32 %v1759_v40, %v926_v5  ;;  %v785_v5 = vpop.f32.mrf.mxu2  ;;  %v946_v62 = vpop.f32.mrf.mxu3 }
 0x46e   :  { %v786_v49 = vadd.f32 %v785_v5, %v3623_v44  ;;  %v471_v5 = vpop.permute.xlu2 %470 }
 0x473   :  { %v1709_v16 = vpop.f32.mrf.mxu0 }
 0x474   :  { %v3649_v55 = vadd.f32 %v1709_v16, %v768_v4  ;;  %v1762_v60 = vpop.f32.mrf.mxu1  ;;  %v941_v4 = vadd.f32 %v940_v56, %v3625_v36 }
 0x475   :  { %v3651_v8 = vadd.f32 %v1762_v60, %v929_v23  ;;  %v947_v23 = vadd.f32 %v946_v62, %v3623_v44  ;;  %v777_v60 = vadd.f32 %v776_v45, %v3631_v18 }
 0x47b   :  { %v1712_v10 = vpop.f32.mrf.mxu0 }
 0x47c   :  { %v3653_v14 = vadd.f32 %v1712_v10, %v771_v19  ;;  %v1765_v11 = vpop.f32.mrf.mxu1 }
 0x47d   :  { %v3655_v29 = vadd.f32 %v1765_v11, %v932_v46 }
 0x483   :  { %v1715_v3 = vpop.f32.mrf.mxu0 }
 0x484   :  { %v3657_v0 = vadd.f32 %v1715_v3, %v774_v39  ;;  %v1768_v50 = vpop.f32.mrf.mxu1 }
 0x485   :  { %v3659_v54 = vadd.f32 %v1768_v50, %v935_v17 }
 0x48b   :  { %v1718_v63 = vpop.f32.mrf.mxu0 }
 0x48c   :  { %v1771_v59 = vpop.f32.mrf.mxu1  ;;  %v1799_v10 = vadd.f32 %v1718_v63, %v777_v60 }
 0x48d   :  { %v1800_v11 = vadd.f32 %v1771_v59, %v938_v28 }
 0x493   :  { %v1721_v32 = vpop.f32.mrf.mxu0 }
 0x494   :  { %v1774_v61 = vpop.f32.mrf.mxu1  ;;  %v1801_v2 = vadd.f32 %v1721_v32, %v780_v35 }
 0x495   :  { %v1802_v19 = vadd.f32 %v1774_v61, %v941_v4  ;;  %v2272_v61 = vld [vmem:[%s3730_s6 + $0x40] sm:$0xff] }
 0x49b   :  { %v1724_v9 = vpop.f32.mrf.mxu0 }
 0x49c   :  { %v1777_v7 = vpop.f32.mrf.mxu1  ;;  %v1803_v40 = vadd.f32 %v1724_v9, %v783_v33  ;;  %v2274_v9 = vld [vmem:[%s3730_s6 + $0x50] sm:$0xff]  ;;  %v788_v33 = vpop.f32.mrf.mxu2 }
 0x49d   :  { %v1804_v27 = vadd.f32 %v1777_v7, %v944_v42  ;;  %v2275_v7 = vld [vmem:[%s3730_s6 + $0x58] sm:$0xff]  ;;  %v949_v42 = vpop.f32.mrf.mxu3  ;;  %v789_v62 = vadd.f32 %v788_v33, %v471_v5  ;;  %s2526_s6 = smov [#allocation3]  }
 0x49e   :  { %2435 = vtanh.f32 %v1803_v40  ;;  %v950_v40 = vadd.f32 %v949_v42, %v471_v5  ;;  %s2037_s7 = sshll.u32 %s2526_s6, 4  ;;  %s2038_s7 = int_to_ptr.vmem [resolvable:$true] %s2037_s7 }
 0x49f   :  { %2437 = vtanh.f32 %v1804_v27 }
 0x4a3   :  { %v1727_v16 = vpop.f32.mrf.mxu0 }
 0x4a4   :  { %v1805_v34 = vadd.f32 %v1727_v16, %v786_v49  ;;  %v1780_v22 = vpop.f32.mrf.mxu1  ;;  %v2436_v36 = vpop.eup %2435 }
 0x4a5   :  { %v1806_v46 = vadd.f32 %v1780_v22, %v947_v23  ;;  %v2438_v44 = vpop.eup %2437  ;;  %v1840_v3 = vmul.f32 %v2436_v36, %v3543_v6  ;;  %v791_v27 = vpop.f32.mrf.mxu2 }
 0x4a6   :  { %2439 = vtanh.f32 %v1805_v34  ;;  %v1841_v52 = vmul.f32 %v2438_v44, %v3545_v1  ;;  %v952_v49 = vpop.f32.mrf.mxu3  ;;  %v476_v34 = vpop.permute.xlu0 %475 }
 0x4a7   :  { %2441 = vtanh.f32 %v1806_v46 }
 0x4a8   :  { %2443 = vtanh.f32 %v1801_v2 }
 0x4a9   :  { %2445 = vtanh.f32 %v1802_v19 }
 0x4aa   :  { %2447 = vtanh.f32 %v1799_v10 }
 0x4ab   :  { %2449 = vtanh.f32 %v1800_v11 }
 0x4ac   :  { %v2440_v15 = vpop.eup %2439  ;;  %2451 = vtanh.f32 %v3645_v48  ;;  %v792_v48 = vadd.f32 %v791_v27, %v476_v34 }
 0x4ad   :  { %v2442_v45 = vpop.eup %2441  ;;  %v1842_v39 = vmul.f32 %v2440_v15, %v3549_v26  ;;  %2453 = vtanh.f32 %v3647_v21  ;;  %v953_v21 = vadd.f32 %v952_v49, %v476_v34  ;;  %v794_v44 = vpop.f32.mrf.mxu2 }
 0x4ae   :  { %v2444_v17 = vpop.eup %2443  ;;  %v1843_v18 = vmul.f32 %v2442_v45, %v3551_v47  ;;  %2455 = vtanh.f32 %v3627_v13 }
 0x4af   :  { %v2446_v58 = vpop.eup %2445  ;;  %1868 = vmatpush.msra.mxu0 %v1842_v39  ;;  %v1838_v56 = vmul.f32 %v2444_v17, %v3533_v37  ;;  %2457 = vtanh.f32 %v3629_v31  ;;  %v481_v39 = vpop.permute.xlu2 %480 }
 0x4b0   :  { %v2448_v50 = vpop.eup %2447  ;;  %1897 = vmatpush.msra.mxu1 %v1843_v18  ;;  %v1839_v59 = vmul.f32 %v2446_v58, %v3536_v57  ;;  %v955_v17 = vpop.f32.mrf.mxu3 }
 0x4b1   :  { %v2450_v63 = vpop.eup %2449  ;;  %1869 = vmatpush.msra.mxu0 %v1840_v3  ;;  %v1836_v32 = vmul.f32 %v2448_v50, %v3513_v53 }
 0x4b2   :  { %1898 = vmatpush.msra.mxu1 %v1841_v52  ;;  %v1837_v25 = vmul.f32 %v2450_v63, %v3516_v12  ;;  %v2452_v60 = vpop.eup %2451  ;;  %v795_v63 = vadd.f32 %v794_v44, %v481_v39 }
 0x4b3   :  { %1870 = vmatpush.msra.mxu0 %v1838_v56  ;;  %v2454_v2 = vpop.eup %2453  ;;  %v1930_v19 = vsub.f32 1.0, %v2452_v60  ;;  %v956_v56 = vadd.f32 %v955_v17, %v481_v39 }
 0x4b4   :  { %1899 = vmatpush.msra.mxu1 %v1839_v59  ;;  %v2456_v22 = vpop.eup %2455  ;;  %v1931_v31 = vsub.f32 1.0, %v2454_v2 }
 0x4b5   :  { %1871 = vmatpush.msra.mxu0 %v1836_v32  ;;  %v2458_v28 = vpop.eup %2457  ;;  %v1946_v15 = vmul.f32 %v2456_v22, %v3513_v53 }
 0x4b6   :  { %1900 = vmatpush.msra.mxu1 %v1837_v25  ;;  %2276 = vmatmul.msk.f32.vlgmr.msra.gmra.mxu0 %vm973_vm2, %v2272_v61  ;;  %v1947_v18 = vmul.f32 %v2458_v28, %v3516_v12 }
 0x4b7   :  { %2280 = vmatmul.msk.f32.vlgmr.msra.gmra.mxu1 %vm973_vm2, %v2272_v61  ;;  %v1974_v27 = vpop.permute.xlu2 %1973 }
 0x4be   :  { %2277 = vmatmul.msk.f32.gmra.mxu0 %vm973_vm2, %v2273_v20 }
 0x4bf   :  { %2281 = vmatmul.msk.f32.gmra.mxu1 %vm973_vm2, %v2273_v20 }
 0x4c6   :  { %2278 = vmatmul.msk.f32.gmra.mxu0 %vm973_vm2, %v2274_v9 }
 0x4c7   :  { %2282 = vmatmul.msk.f32.gmra.mxu1 %vm973_vm2, %v2274_v9 }
 0x4ce   :  { %2279 = vmatmul.msk.f32.gmra.mxu0 %vm973_vm2, %v2275_v7 }
 0x4cf   :  { %2283 = vmatmul.msk.f32.gmra.mxu1 %vm973_vm2, %v2275_v7 }
 0x533   :  { %v1873_v35 = vpop.f32.mrf.mxu0 }
 0x534   :  { %v1914_v4 = vadd.f32 %v1873_v35, %v789_v62  ;;  %v1902_v23 = vpop.f32.mrf.mxu1  ;;  %v797_v62 = vpop.f32.mrf.mxu2 }
 0x535   :  { %v1915_v16 = vadd.f32 %v1902_v23, %v950_v40  ;;  %v958_v35 = vpop.f32.mrf.mxu3 }
 0x536   :  { %2459 = vtanh.f32 %v1914_v4 }
 0x537   :  { %2461 = vtanh.f32 %v1915_v16 }
 0x538   :  { %2463 = vtanh.f32 %v3649_v55 }
 0x539   :  { %2465 = vtanh.f32 %v3651_v8 }
 0x53a   :  { %2467 = vtanh.f32 %v3633_v38 }
 0x53b   :  { %v1876_v13 = vpop.f32.mrf.mxu0  ;;  %2469 = vtanh.f32 %v3635_v41 }
 0x53c   :  { %v2460_v46 = vpop.eup %2459  ;;  %v1916_v10 = vadd.f32 %v1876_v13, %v792_v48  ;;  %v1905_v11 = vpop.f32.mrf.mxu1 }
 0x53d   :  { %v2462_v36 = vpop.eup %2461  ;;  %v1938_v45 = vmul.f32 %v2460_v46, %v1930_v19  ;;  %v1917_v55 = vadd.f32 %v1905_v11, %v953_v21 }
 0x53e   :  { %v1939_v8 = vmul.f32 %v2462_v36, %v1931_v31  ;;  %2471 = vtanh.f32 %v1916_v10  ;;  %v2464_v38 = vpop.eup %2463 }
 0x53f   :  { %v1954_v58 = vadd.f32 %v1946_v15, %v1938_v45  ;;  %2473 = vtanh.f32 %v1917_v55  ;;  %v2466_v50 = vpop.eup %2465  ;;  %v1932_v41 = vsub.f32 1.0, %v2464_v38 }
 0x540   :  { %v1955_v3 = vadd.f32 %v1947_v18, %v1939_v8  ;;  %v2468_v52 = vpop.eup %2467  ;;  %2475 = vtanh.f32 %v3653_v14  ;;  %v1933_v12 = vsub.f32 1.0, %v2466_v50  ;;  %v486_v14 = vpop.permute.xlu0 %485 }
 0x541   :  { %v2470_v53 = vpop.eup %2469  ;;  %2477 = vtanh.f32 %v3655_v29  ;;  %v1948_v9 = vmul.f32 %v2468_v52, %v3533_v37  ;;  %v1969_v29 = vpop.permute.xlu1 %1968  ;;  %v959_v34 = vadd.f32 %v958_v35, %v486_v14 }
 0x542   :  { %2479 = vtanh.f32 %v3637_v51  ;;  %v1949_v42 = vmul.f32 %v2470_v53, %v3536_v57  ;;  %v1986_v23 = vmul.f32 %v1969_v29, %v1954_v58  ;;  %v1987_v60 = vmul.f32 %v1969_v29, %v1955_v3 }
 0x543   :  { %v1879_v59 = vpop.f32.mrf.mxu0  ;;  %2481 = vtanh.f32 %v3639_v30  ;;  %v798_v30 = vadd.f32 %v797_v62, %v486_v14 }
 0x544   :  { %v2472_v32 = vpop.eup %2471  ;;  %v1918_v61 = vadd.f32 %v1879_v59, %v795_v63  ;;  %v1908_v25 = vpop.f32.mrf.mxu1 }
 0x545   :  { %v2474_v20 = vpop.eup %2473  ;;  %v1940_v7 = vmul.f32 %v2472_v32, %v1932_v41  ;;  %v1919_v33 = vadd.f32 %v1908_v25, %v956_v56 }
 0x546   :  { %v1941_v5 = vmul.f32 %v2474_v20, %v1933_v12  ;;  %2483 = vtanh.f32 %v1918_v61  ;;  %v2476_v51 = vpop.eup %2475 }
 0x547   :  { %v1956_v40 = vadd.f32 %v1948_v9, %v1940_v7  ;;  %2485 = vtanh.f32 %v1919_v33  ;;  %v2478_v4 = vpop.eup %2477  ;;  %v1934_v22 = vsub.f32 1.0, %v2476_v51 }
 0x548   :  { %v1957_v49 = vadd.f32 %v1949_v42, %v1941_v5  ;;  %v2480_v16 = vpop.eup %2479  ;;  %2487 = vtanh.f32 %v3657_v0  ;;  %v1935_v19 = vsub.f32 1.0, %v2478_v4  ;;  %v1979_v55 = vpop.permute.xlu0 %1978 }
 0x549   :  { %v1988_v37 = vmul.f32 %v1974_v27, %v1956_v40  ;;  %v2482_v57 = vpop.eup %2481  ;;  %2489 = vtanh.f32 %v3659_v54  ;;  %v1950_v11 = vmul.f32 %v2480_v16, %v3543_v6  ;;  %v1984_v59 = vpop.permute.xlu1 %1983 }
 0x54a   :  { %v1989_v2 = vmul.f32 %v1974_v27, %v1957_v49  ;;  %2491 = vtanh.f32 %v3641_v24  ;;  %v1951_v44 = vmul.f32 %v2482_v57, %v3545_v1  ;;  %v2027_v49 = vlaneseq }
 0x54b   :  { %v1994_v48 = vadd.f32 %v1988_v37, %v1986_v23  ;;  %v1882_v28 = vpop.f32.mrf.mxu0  ;;  %2493 = vtanh.f32 %v3643_v43 }
 0x54c   :  { %v2484_v21 = vpop.eup %2483  ;;  %v2003_v13 = vadd.f32 %v1989_v2, %v1987_v60  ;;  %v1920_v46 = vadd.f32 %v1882_v28, %v798_v30  ;;  %v1911_v31 = vpop.f32.mrf.mxu1  ;;  %vm2029_vm4 = vcmp.lt.s32.totalorder %v2027_v49, 256 }
 0x54d   :  { %v2486_v10 = vpop.eup %2485  ;;  %v1942_v0 = vmul.f32 %v2484_v21, %v1934_v22  ;;  %v1921_v36 = vadd.f32 %v1911_v31, %v959_v34 }
 0x54e   :  { %v1943_v15 = vmul.f32 %v2486_v10, %v1935_v19  ;;  %2495 = vtanh.f32 %v1920_v46  ;;  %v2488_v45 = vpop.eup %2487 }
 0x54f   :  { %v1958_v54 = vadd.f32 %v1950_v11, %v1942_v0  ;;  %2497 = vtanh.f32 %v1921_v36  ;;  %v2490_v39 = vpop.eup %2489  ;;  %v1936_v38 = vsub.f32 1.0, %v2488_v45 }
 0x550   :  { %v1959_v24 = vadd.f32 %v1951_v44, %v1943_v15  ;;  %v2492_v18 = vpop.eup %2491  ;;  %v1937_v43 = vsub.f32 1.0, %v2490_v39 }
 0x551   :  { %v1990_v17 = vmul.f32 %v1979_v55, %v1958_v54  ;;  %v2494_v58 = vpop.eup %2493  ;;  %v1952_v1 = vmul.f32 %v2492_v18, %v3549_v26  ;;  %v2016_v26 = vpop.permute.xlu2 %2015 }
 0x552   :  { %v1991_v8 = vmul.f32 %v1979_v55, %v1959_v24  ;;  %v1953_v53 = vmul.f32 %v2494_v58, %v3551_v47  ;;  %v2018_v47 = vperm.slane %v2016_v26, 0 }
 0x553   :  { %v1995_v6 = vadd.f32 %v1994_v48, %v1990_v17 }
 0x554   :  { %v2496_v3 = vpop.eup %2495  ;;  %v2004_v50 = vadd.f32 %v2003_v13, %v1991_v8 }
 0x555   :  { %v2498_v52 = vpop.eup %2497  ;;  %v1944_v63 = vmul.f32 %v2496_v3, %v1936_v38 }
 0x556   :  { %v1945_v56 = vmul.f32 %v2498_v52, %v1937_v43 }
 0x557   :  { %v1960_v41 = vadd.f32 %v1952_v1, %v1944_v63 }
 0x558   :  { %v1961_v32 = vadd.f32 %v1953_v53, %v1945_v56 }
 0x559   :  { %v1992_v12 = vmul.f32 %v1984_v59, %v1960_v41 }
 0x55a   :  { %v1993_v61 = vmul.f32 %v1984_v59, %v1961_v32 }
 0x55b   :  { %v1996_v25 = vadd.f32 %v1995_v6, %v1992_v12 }
 0x55c   :  { %v2005_v20 = vadd.f32 %v2004_v50, %v1993_v61 }
 0x55d   :  { %v1997_v9 = vrot.slane %v1996_v25, 4 }
 0x55e   :  { %v2006_v7 = vrot.slane %v2005_v20, 4 }
 0x55f   :  { %v1998_v33 = vadd.f32 %v1997_v9, %v1996_v25 }
 0x560   :  { %v2007_v14 = vadd.f32 %v2006_v7, %v2005_v20 }
 0x561   :  { %v1999_v42 = vrot.slane %v1998_v33, 2 }
 0x562   :  { %v2008_v5 = vrot.slane %v2007_v14, 2 }
 0x563   :  { %v2000_v29 = vadd.f32 %v1999_v42, %v1998_v33 }
 0x564   :  { %v2009_v62 = vadd.f32 %v2008_v5, %v2007_v14 }
 0x565   :  { %v2001_v40 = vrot.slane %v2000_v29, 1 }
 0x566   :  { %v2010_v51 = vrot.slane %v2009_v62, 1 }
 0x567   :  { %v2002_v27 = vadd.f32 %v2001_v40, %v2000_v29 }
 0x568   :  { %v2011_v35 = vadd.f32 %v2010_v51, %v2009_v62 }
 0x569   :  { %v2019_v23 = vadd.f32 %v2018_v47, %v2002_v27 }
 0x56a   :  { %v2020_v4 = vadd.f32 %v2018_v47, %v2011_v35 }
 0x56c   :  { %v2023_v37 = vrot.slane %v2020_v4, 7 }
 0x56e   :  { %v2025_v16 = vsel %vm2024_vm3, %v2019_v23, %v2023_v37 }
 0x56f   :  { %2031 = vst.msk [vmem:[#allocation3] sm:$0x3] %vm2029_vm4, %v2025_v16 }
 0x570   :  { %2042 = dma.vmem_to_hbm [thread:$0]  %s2038_s7, 32, %s2040_s1, [#allocation4]  }
 0x571   :  { %2523 = dma.done.wait [#allocation4], 32  }
 0x572   :  { %2524 = vsyncadd [#allocation4], 4294967264 }
 0x573   :  { %2047 = vsyncpa [#allocation4], 1 }

</bundles_post_ra>
